<compile_context>
chip_gen: v6e
topology: v6e:2x2x1
jax: 0.10.0
libtpu: 0.0.40
codegen_flags: <defaults>
</compile_context>

<pallas_src>
import functools

import jax
import jax.numpy as jnp
from jax.experimental import pallas as pl
from jax.experimental.pallas import tpu as pltpu

EPS = 1e-5  # PyTorch BatchNorm2d default eps


# ------------------------------ fused kernel --------------------------------

def _fused_irb_kernel(x_ref, exp_ref, shift0_ref, wdw_ref, shift1_ref, mask_ref,
                      w1_ref, b1_ref, w2_ref, b2_ref, wpf_ref, shift2_ref,
                      o_ref, *, H, W, B, has_expand, use_res):
    HW = H * W
    inv_hw = 1.0 / HW

    # Constants: loaded once per grid step, shared by the B images of this step.
    exp_w = exp_ref[...]
    shift0 = shift0_ref[...]                # (mid, 1)
    wdw = wdw_ref[...]                      # (9, mid, 1)  BN1 scale folded
    shift1 = shift1_ref[...]                # (mid, 1)
    m_col_nolast = mask_ref[0]              # (1, HW)  0 at col W-1  (src premask, dw=-1)
    m_col_nofirst = mask_ref[1]             # (1, HW)  0 at col 0    (src premask, dw=+1)
    m_row_nofirst = mask_ref[2]             # (1, HW)  0 at row 0    (out mask, dh=-1)
    m_row_nolast = mask_ref[3]              # (1, HW)  0 at row H-1  (out mask, dh=+1)
    w1 = w1_ref[...]                        # (mid, red)
    b1 = b1_ref[...]                        # (1, red)
    w2 = w2_ref[...]                        # (mid, red)
    b2 = b2_ref[...]                        # (mid, 1)
    wpf = wpf_ref[...]                      # (out_ch, mid)  BN2 scale folded
    shift2 = shift2_ref[...]                # (out_ch, 1)

    for b in range(B):                      # static unroll; B kept small by the wrapper
        x = x_ref[b]                        # (Cin, HW), lane-dense

        # ---- stage 1: expand 1x1 conv (BN0 scale folded) + relu6 ----
        if has_expand:
            a1 = jnp.dot(exp_w, x, preferred_element_type=jnp.float32)   # (mid, HW)
        else:
            a1 = x * exp_w                  # nn.Identity(): only the BN0 scale remains
        a1 = jnp.clip(a1 + shift0, 0.0, 6.0)

        # ---- stage 2: depthwise 3x3, pad=1, stride=1 (BN1 scale folded) + relu6 ----
        # Every tap is a lane rotation of a1 (XLU slot, co-issues with the VPU MACs);
        # padded edges are realized by 2 column pre-masks + 2 row post-masks.
        src_m1 = pltpu.roll(a1 * m_col_nolast, shift=1, axis=1)        # reads (h, w-1)
        src_p1 = pltpu.roll(a1 * m_col_nofirst, shift=HW - 1, axis=1)  # reads (h, w+1)

        def dh_part(r):                     # r = dh + 1; taps r*3 + (dw+1)
            return (src_m1 * wdw[3 * r + 0]
                    + a1 * wdw[3 * r + 1]
                    + src_p1 * wdw[3 * r + 2])

        acc = pltpu.roll(dh_part(0), shift=W, axis=1) * m_row_nofirst        # dh = -1
        acc = acc + dh_part(1)                                               # dh =  0
        acc = acc + pltpu.roll(dh_part(2), shift=HW - W, axis=1) * m_row_nolast  # dh = +1
        a2 = jnp.clip(acc + shift1, 0.0, 6.0)                                # (mid, HW)

        # ---- stage 3: squeeze-excite, entirely on VPU/XLU (no tiny MXU matvecs) ----
        s = jnp.sum(a2, axis=1, keepdims=True) * inv_hw                      # (mid, 1)
        h = jnp.maximum(jnp.sum(w1 * s, axis=0, keepdims=True) + b1, 0.0)    # (1, red)
        g = jax.nn.sigmoid(jnp.sum(w2 * h, axis=1, keepdims=True) + b2)      # (mid, 1)

        # ---- stage 4: project 1x1 conv (BN2 scale folded) + shift + residual ----
        y = jnp.dot(wpf, a2 * g, preferred_element_type=jnp.float32) + shift2
        if use_res:
            y = y + x                       # valid: stride==1 and Cin==out_ch
        o_ref[b] = y.astype(o_ref.dtype)


# ------------------------------- parameters ---------------------------------

def init_params(key, in_ch, out_ch, expand_ratio, se_ratio=0.25):
    mid = in_ch * expand_ratio
    red = max(1, int(mid * se_ratio))
    keys = iter(jax.random.split(key, 32))

    def nrm(shape, scale=0.2):
        return (scale * jax.random.normal(next(keys), shape)).astype(jnp.float32)

    def bn_params(c):
        gamma = 1.0 + nrm((c,), 0.1)
        beta = nrm((c,), 0.1)
        mean = nrm((c,), 0.1)
        var = jnp.abs(nrm((c,), 0.3)) + 0.5
        return (gamma, beta, mean, var)

    p = {}
    if expand_ratio != 1:
        p["w_expand"] = nrm((in_ch, mid))
        p["b_expand"] = nrm((mid,), 0.05)
    else:
        p["w_expand"] = None          # nn.Identity(): no matmul, handled in-kernel
        p["b_expand"] = None
    p["bn0"] = bn_params(mid)
    p["w_dw"] = nrm((3, 3, mid))
    p["b_dw"] = nrm((mid,), 0.05)
    p["bn1"] = bn_params(mid)
    p["w_fc1"] = nrm((mid, red))
    p["b_fc1"] = nrm((red,), 0.05)
    p["w_fc2"] = nrm((red, mid))
    p["b_fc2"] = nrm((mid,), 0.05)
    p["w_proj"] = nrm((mid, out_ch))
    p["b_proj"] = nrm((out_ch,), 0.05)
    p["bn2"] = bn_params(out_ch)
    return p, mid, red


def _fold_bn(bn, conv_bias):
    gamma, beta, mean, var = bn
    scale = gamma / jnp.sqrt(var + EPS)
    shift = (conv_bias - mean) * scale + beta
    return scale, shift


def _const_spec(shape):
    zeros = (0,) * len(shape)
    return pl.BlockSpec(shape, lambda n, _z=zeros: _z)


def _choose_images_per_step(n, c_in, mid, out_ch, hw):
    """Largest divisor B of n s.t. the grid keeps >=2 steps (v7x megacore) and the
    per-step live-activation footprint stays well under the scoped-VMEM default."""
    per_img_bytes = 4 * hw * (c_in + out_ch + 8 * mid)   # rough live-vreg/VMEM bound
    budget = 16 * 1024 * 1024                            # conservative (v7x: 32 MiB scoped)
    best = 1
    for b in range(1, n + 1):
        if n % b:
            continue
        if n >= 2 and n // b < 2:
            break
        if b * per_img_bytes > budget:
            break
        best = b
    return best


# --------------------------------- wrapper -----------------------------------

def inverted_res_block_pallas(x_nchw, p, *, stride, use_res, images_per_step=None):
    N, Cin, H, W = x_nchw.shape
    # TODO(synk): stride>1 depthwise path intentionally not implemented in the fused
    # kernel (gated off per perf review); only the stride==1 hot path is supported.
    assert stride == 1, "fused Pallas InvertedResBlock kernel supports stride==1 only"
    has_expand = p["w_expand"] is not None
    mid = p["w_dw"].shape[-1]
    red = p["w_fc1"].shape[1]
    out_ch = p["w_proj"].shape[1]
    HW = H * W
    if use_res:
        assert Cin == out_ch, "residual path requires in_ch == out_ch"

    f32 = jnp.float32
    x_flat = x_nchw.reshape(N, Cin, HW).astype(f32)     # NCHW -> (N, C, HW), free reshape

    if images_per_step is None:
        images_per_step = _choose_images_per_step(N, Cin, mid, out_ch, HW)
    B = images_per_step
    assert N % B == 0
    G = N // B

    b_exp = p["b_expand"] if has_expand else jnp.zeros((mid,), f32)
    scale0, shift0 = _fold_bn(p["bn0"], b_exp)
    scale1, shift1 = _fold_bn(p["bn1"], p["b_dw"])
    scale2, shift2 = _fold_bn(p["bn2"], p["b_proj"])

    if has_expand:
        exp_arg = (p["w_expand"].T * scale0[:, None]).astype(f32)   # (mid, Cin)
    else:
        exp_arg = scale0.reshape(mid, 1).astype(f32)                # (mid, 1)
    shift0c = shift0.reshape(mid, 1).astype(f32)
    # depthwise weights: (3,3,mid) -> (9, mid, 1), BN1 scale folded per channel
    wdw = (p["w_dw"] * scale1).reshape(9, mid, 1).astype(f32)
    shift1c = shift1.reshape(mid, 1).astype(f32)
    # SE weights laid out so FC1/FC2 run as VPU broadcast-mul + XLU reductions
    w1 = p["w_fc1"].astype(f32)                                     # (mid, red)
    b1r = p["b_fc1"].reshape(1, red).astype(f32)
    w2 = p["w_fc2"].T.astype(f32)                                   # (mid, red)
    b2c = p["b_fc2"].reshape(mid, 1).astype(f32)
    # project weights with BN2 scale folded
    wpf = (p["w_proj"].T * scale2[:, None]).astype(f32)             # (out_ch, mid)
    shift2c = shift2.reshape(out_ch, 1).astype(f32)

    # edge masks for the roll-based depthwise taps
    idx = jnp.arange(HW, dtype=jnp.int32)
    col = idx % W
    row = idx // W
    masks = jnp.stack([
        (col != W - 1),     # source premask for dw = -1 taps
        (col != 0),         # source premask for dw = +1 taps
        (row != 0),         # output mask for dh = -1 taps
        (row != H - 1),     # output mask for dh = +1 taps
    ]).astype(f32).reshape(4, 1, HW)

    kernel = functools.partial(
        _fused_irb_kernel, H=H, W=W, B=B,
        has_expand=has_expand, use_res=use_res)

    # advisory cost estimate (helps XLA schedule around a small kernel)
    flops = N * ((2 * Cin * mid * HW if has_expand else mid * HW)
                 + 26 * mid * HW + 4 * mid * red + 2 * out_ch * mid * HW)
    bytes_acc = 4 * (N * (Cin + out_ch) * HW
                     + (mid * Cin if has_expand else mid)
                     + 9 * mid + 2 * mid * red + out_ch * mid
                     + 3 * mid + out_ch + red + 4 * HW)
    cost = pl.CostEstimate(flops=int(flops), transcendentals=int(N * mid),
                           bytes_accessed=int(bytes_acc))

    y = pl.pallas_call(
        kernel,
        out_shape=jax.ShapeDtypeStruct((N, out_ch, HW), f32),
        grid=(G,),
        in_specs=[
            pl.BlockSpec((B, Cin, HW), lambda n: (n, 0, 0)),
            _const_spec(exp_arg.shape),
            _const_spec((mid, 1)),
            _const_spec((9, mid, 1)),
            _const_spec((mid, 1)),
            _const_spec((4, 1, HW)),
            _const_spec((mid, red)),
            _const_spec((1, red)),
            _const_spec((mid, red)),
            _const_spec((mid, 1)),
            _const_spec((out_ch, mid)),
            _const_spec((out_ch, 1)),
        ],
        out_specs=pl.BlockSpec((B, out_ch, HW), lambda n: (n, 0, 0)),
        compiler_params=pltpu.CompilerParams(
            dimension_semantics=("parallel",)),
        cost_estimate=cost,
    )(x_flat, exp_arg, shift0c, wdw, shift1c, masks,
      w1, b1r, w2, b2c, wpf, shift2c)

    return y.reshape(N, out_ch, H, W)                  # already NCHW order


# ---------------------------- pure-JAX reference -----------------------------

def _bn_eval(y, bn):
    gamma, beta, mean, var = bn
    return (y - mean) / jnp.sqrt(var + EPS) * gamma + beta


def reference_forward(x_nchw, p, *, stride, use_res):
    hp = jax.lax.Precision.HIGHEST
    x = jnp.transpose(x_nchw, (0, 2, 3, 1)).astype(jnp.float32)
    if p["w_expand"] is not None:
        y = jnp.einsum("nhwc,cd->nhwd", x, p["w_expand"], precision=hp) + p["b_expand"]
    else:
        y = x
    y = jnp.clip(_bn_eval(y, p["bn0"]), 0.0, 6.0)
    N, H, W, C = y.shape
    Ho = (H + 2 - 3) // stride + 1
    Wo = (W + 2 - 3) // stride + 1
    yp = jnp.pad(y, ((0, 0), (1, 1), (1, 1), (0, 0)))
    acc = jnp.zeros((N, Ho, Wo, C), jnp.float32)
    for kh in range(3):
        for kw in range(3):
            win = yp[:, kh:kh + (Ho - 1) * stride + 1:stride,
                     kw:kw + (Wo - 1) * stride + 1:stride, :]
            acc = acc + win * p["w_dw"][kh, kw]
    y = jnp.clip(_bn_eval(acc + p["b_dw"], p["bn1"]), 0.0, 6.0)
    s = jnp.mean(y, axis=(1, 2), keepdims=True)
    h = jnp.maximum(jnp.einsum("nabc,cd->nabd", s, p["w_fc1"], precision=hp) + p["b_fc1"], 0.0)
    g = jax.nn.sigmoid(jnp.einsum("nabc,cd->nabd", h, p["w_fc2"], precision=hp) + p["b_fc2"])
    y = y * g
    y = jnp.einsum("nhwc,cd->nhwd", y, p["w_proj"], precision=hp) + p["b_proj"]
    y = _bn_eval(y, p["bn2"])
    if use_res:
        y = y + x
    return jnp.transpose(y, (0, 3, 1, 2))


# ------------------------------------ main ------------------------------------

if __name__ == "__main__":
    key = jax.random.PRNGKey(0)

    configs = [
        # (N, in_ch, out_ch, H, W, stride, expand_ratio)
        (2, 8, 8, 16, 16, 1, 4),     # expand path + residual
        (2, 32, 24, 16, 16, 1, 1),   # identity expand, no residual
    ]
    for idx, (N, in_ch, out_ch, H, W, stride, er) in enumerate(configs):
        kx, kp, key = jax.random.split(key, 3)
        use_res = (stride == 1 and in_ch == out_ch)
        x = jax.random.normal(kx, (N, in_ch, H, W), jnp.float32)
        params, _, _ = init_params(kp, in_ch, out_ch, er)

        out = jax.block_until_ready(
            inverted_res_block_pallas(x, params, stride=stride, use_res=use_res))
        ref = jax.block_until_ready(
            reference_forward(x, params, stride=stride, use_res=use_res))

        assert out.shape == ref.shape == (N, out_ch, H, W)
        if not jnp.allclose(out, ref, atol=2e-2, rtol=2e-2):
            raise AssertionError(
                f"config {idx}: max abs diff = {float(jnp.max(jnp.abs(out - ref)))}")

    print("KERNEL_OK")
</pallas_src>

<mosaic_0001>
module attributes {stable_mosaic.version = 11 : i64} {
  func.func @_fused_irb_kernel(%arg0: i32, %arg1: memref<1x8x256xf32, #tpu.memory_space<vmem>>, %arg2: memref<32x8xf32, #tpu.memory_space<vmem>>, %arg3: memref<32x1xf32, #tpu.memory_space<vmem>>, %arg4: memref<9x32x1xf32, #tpu.memory_space<vmem>>, %arg5: memref<32x1xf32, #tpu.memory_space<vmem>>, %arg6: memref<4x1x256xf32, #tpu.memory_space<vmem>>, %arg7: memref<32x8xf32, #tpu.memory_space<vmem>>, %arg8: memref<1x8xf32, #tpu.memory_space<vmem>>, %arg9: memref<32x8xf32, #tpu.memory_space<vmem>>, %arg10: memref<32x1xf32, #tpu.memory_space<vmem>>, %arg11: memref<8x32xf32, #tpu.memory_space<vmem>>, %arg12: memref<8x1xf32, #tpu.memory_space<vmem>>, %arg13: memref<1x8x256xf32, #tpu.memory_space<vmem>>) attributes {dimension_semantics = [#tpu.dimension_semantics<parallel>], iteration_bounds = array<i64: 2>, scalar_prefetch = 0 : i64, scratch_operands = 0 : i64, tpu.core_type = #tpu.core_type<tc>, window_params = [{transform_indices = @transform_0, window_bounds = array<i64: 1, 8, 256>}, {pipeline_mode = #tpu.pipeline_mode<synchronous>, transform_indices = @transform_1, window_bounds = array<i64: 32, 8>}, {pipeline_mode = #tpu.pipeline_mode<synchronous>, transform_indices = @transform_2, window_bounds = array<i64: 32, 1>}, {pipeline_mode = #tpu.pipeline_mode<synchronous>, transform_indices = @transform_3, window_bounds = array<i64: 9, 32, 1>}, {pipeline_mode = #tpu.pipeline_mode<synchronous>, transform_indices = @transform_4, window_bounds = array<i64: 32, 1>}, {pipeline_mode = #tpu.pipeline_mode<synchronous>, transform_indices = @transform_5, window_bounds = array<i64: 4, 1, 256>}, {pipeline_mode = #tpu.pipeline_mode<synchronous>, transform_indices = @transform_6, window_bounds = array<i64: 32, 8>}, {pipeline_mode = #tpu.pipeline_mode<synchronous>, transform_indices = @transform_7, window_bounds = array<i64: 1, 8>}, {pipeline_mode = #tpu.pipeline_mode<synchronous>, transform_indices = @transform_8, window_bounds = array<i64: 32, 8>}, {pipeline_mode = #tpu.pipeline_mode<synchronous>, transform_indices = @transform_9, window_bounds = array<i64: 32, 1>}, {pipeline_mode = #tpu.pipeline_mode<synchronous>, transform_indices = @transform_10, window_bounds = array<i64: 8, 32>}, {pipeline_mode = #tpu.pipeline_mode<synchronous>, transform_indices = @transform_11, window_bounds = array<i64: 8, 1>}, {transform_indices = @transform_12, window_bounds = array<i64: 1, 8, 256>}]} {
    %c0 = arith.constant 0 : index
    %c0_0 = arith.constant 0 : index
    %0 = vector.load %arg2[%c0, %c0_0] : memref<32x8xf32, #tpu.memory_space<vmem>>, vector<32x8xf32>
    %c0_1 = arith.constant 0 : index
    %c0_2 = arith.constant 0 : index
    %1 = vector.load %arg3[%c0_1, %c0_2] : memref<32x1xf32, #tpu.memory_space<vmem>>, vector<32x1xf32>
    %c0_3 = arith.constant 0 : index
    %c0_4 = arith.constant 0 : index
    %c0_5 = arith.constant 0 : index
    %2 = vector.load %arg4[%c0_3, %c0_4, %c0_5] : memref<9x32x1xf32, #tpu.memory_space<vmem>>, vector<9x32x1xf32>
    %c0_6 = arith.constant 0 : index
    %c0_7 = arith.constant 0 : index
    %3 = vector.load %arg5[%c0_6, %c0_7] : memref<32x1xf32, #tpu.memory_space<vmem>>, vector<32x1xf32>
    %c0_8 = arith.constant 0 : index
    %c0_9 = arith.constant 0 : index
    %c0_10 = arith.constant 0 : index
    %4 = vector.load %arg6[%c0_8, %c0_9, %c0_10] : memref<4x1x256xf32, #tpu.memory_space<vmem>>, vector<1x1x256xf32>
    %5 = vector.shape_cast %4 : vector<1x1x256xf32> to vector<1x256xf32>
    %c1 = arith.constant 1 : index
    %c0_11 = arith.constant 0 : index
    %c0_12 = arith.constant 0 : index
    %6 = vector.load %arg6[%c1, %c0_11, %c0_12] : memref<4x1x256xf32, #tpu.memory_space<vmem>>, vector<1x1x256xf32>
    %7 = vector.shape_cast %6 : vector<1x1x256xf32> to vector<1x256xf32>
    %c2 = arith.constant 2 : index
    %c0_13 = arith.constant 0 : index
    %c0_14 = arith.constant 0 : index
    %8 = vector.load %arg6[%c2, %c0_13, %c0_14] : memref<4x1x256xf32, #tpu.memory_space<vmem>>, vector<1x1x256xf32>
    %9 = vector.shape_cast %8 : vector<1x1x256xf32> to vector<1x256xf32>
    %c3 = arith.constant 3 : index
    %c0_15 = arith.constant 0 : index
    %c0_16 = arith.constant 0 : index
    %10 = vector.load %arg6[%c3, %c0_15, %c0_16] : memref<4x1x256xf32, #tpu.memory_space<vmem>>, vector<1x1x256xf32>
    %11 = vector.shape_cast %10 : vector<1x1x256xf32> to vector<1x256xf32>
    %c0_17 = arith.constant 0 : index
    %c0_18 = arith.constant 0 : index
    %12 = vector.load %arg7[%c0_17, %c0_18] : memref<32x8xf32, #tpu.memory_space<vmem>>, vector<32x8xf32>
    %c0_19 = arith.constant 0 : index
    %c0_20 = arith.constant 0 : index
    %13 = vector.load %arg8[%c0_19, %c0_20] : memref<1x8xf32, #tpu.memory_space<vmem>>, vector<1x8xf32>
    %c0_21 = arith.constant 0 : index
    %c0_22 = arith.constant 0 : index
    %14 = vector.load %arg9[%c0_21, %c0_22] : memref<32x8xf32, #tpu.memory_space<vmem>>, vector<32x8xf32>
    %c0_23 = arith.constant 0 : index
    %c0_24 = arith.constant 0 : index
    %15 = vector.load %arg10[%c0_23, %c0_24] : memref<32x1xf32, #tpu.memory_space<vmem>>, vector<32x1xf32>
    %c0_25 = arith.constant 0 : index
    %c0_26 = arith.constant 0 : index
    %16 = vector.load %arg11[%c0_25, %c0_26] : memref<8x32xf32, #tpu.memory_space<vmem>>, vector<8x32xf32>
    %c0_27 = arith.constant 0 : index
    %c0_28 = arith.constant 0 : index
    %17 = vector.load %arg12[%c0_27, %c0_28] : memref<8x1xf32, #tpu.memory_space<vmem>>, vector<8x1xf32>
    %c0_29 = arith.constant 0 : index
    %c0_30 = arith.constant 0 : index
    %c0_31 = arith.constant 0 : index
    %18 = vector.load %arg1[%c0_29, %c0_30, %c0_31] : memref<1x8x256xf32, #tpu.memory_space<vmem>>, vector<1x8x256xf32>
    %19 = vector.shape_cast %18 : vector<1x8x256xf32> to vector<8x256xf32>
    %cst = arith.constant dense<0.000000e+00> : vector<32x256xf32>
    %20 = tpu.matmul %0, %19, %cst {dimension_numbers = #tpu.dot_dimension_numbers<[1], [0], [0], [1], [0, 0, 1, 1], [], []>} : vector<32x8xf32>, vector<8x256xf32>, vector<32x256xf32> -> vector<32x256xf32>
    %21 = vector.broadcast %1 : vector<32x1xf32> to vector<32x256xf32>
    %22 = arith.addf %20, %21 : vector<32x256xf32>
    %cst_32 = arith.constant 0.000000e+00 : f32
    %cst_33 = arith.constant 6.000000e+00 : f32
    %23 = vector.broadcast %cst_32 : f32 to vector<32x256xf32>
    %24 = arith.maximumf %23, %22 : vector<32x256xf32>
    %25 = vector.broadcast %cst_33 : f32 to vector<32x256xf32>
    %26 = arith.minimumf %25, %24 : vector<32x256xf32>
    %27 = vector.broadcast %5 : vector<1x256xf32> to vector<32x256xf32>
    %28 = arith.mulf %26, %27 : vector<32x256xf32>
    %c1_i32 = arith.constant 1 : i32
    %29 = tpu.dynamic_rotate %28 by %c1_i32 dim 1 : vector<32x256xf32>, i32 -> vector<32x256xf32>
    %30 = vector.broadcast %7 : vector<1x256xf32> to vector<32x256xf32>
    %31 = arith.mulf %26, %30 : vector<32x256xf32>
    %c255_i32 = arith.constant 255 : i32
    %32 = tpu.dynamic_rotate %31 by %c255_i32 dim 1 : vector<32x256xf32>, i32 -> vector<32x256xf32>
    %33 = vector.extract_strided_slice %2 {offsets = [0, 0, 0], sizes = [1, 32, 1], strides = [1, 1, 1]} : vector<9x32x1xf32> to vector<1x32x1xf32>
    %34 = vector.shape_cast %33 : vector<1x32x1xf32> to vector<32x1xf32>
    %35 = vector.broadcast %34 : vector<32x1xf32> to vector<32x256xf32>
    %36 = arith.mulf %29, %35 : vector<32x256xf32>
    %37 = vector.extract_strided_slice %2 {offsets = [1, 0, 0], sizes = [1, 32, 1], strides = [1, 1, 1]} : vector<9x32x1xf32> to vector<1x32x1xf32>
    %38 = vector.shape_cast %37 : vector<1x32x1xf32> to vector<32x1xf32>
    %39 = vector.broadcast %38 : vector<32x1xf32> to vector<32x256xf32>
    %40 = arith.mulf %26, %39 : vector<32x256xf32>
    %41 = arith.addf %36, %40 : vector<32x256xf32>
    %42 = vector.extract_strided_slice %2 {offsets = [2, 0, 0], sizes = [1, 32, 1], strides = [1, 1, 1]} : vector<9x32x1xf32> to vector<1x32x1xf32>
    %43 = vector.shape_cast %42 : vector<1x32x1xf32> to vector<32x1xf32>
    %44 = vector.broadcast %43 : vector<32x1xf32> to vector<32x256xf32>
    %45 = arith.mulf %32, %44 : vector<32x256xf32>
    %46 = arith.addf %41, %45 : vector<32x256xf32>
    %c16_i32 = arith.constant 16 : i32
    %47 = tpu.dynamic_rotate %46 by %c16_i32 dim 1 : vector<32x256xf32>, i32 -> vector<32x256xf32>
    %48 = vector.broadcast %9 : vector<1x256xf32> to vector<32x256xf32>
    %49 = arith.mulf %47, %48 : vector<32x256xf32>
    %50 = vector.extract_strided_slice %2 {offsets = [3, 0, 0], sizes = [1, 32, 1], strides = [1, 1, 1]} : vector<9x32x1xf32> to vector<1x32x1xf32>
    %51 = vector.shape_cast %50 : vector<1x32x1xf32> to vector<32x1xf32>
    %52 = vector.broadcast %51 : vector<32x1xf32> to vector<32x256xf32>
    %53 = arith.mulf %29, %52 : vector<32x256xf32>
    %54 = vector.extract_strided_slice %2 {offsets = [4, 0, 0], sizes = [1, 32, 1], strides = [1, 1, 1]} : vector<9x32x1xf32> to vector<1x32x1xf32>
    %55 = vector.shape_cast %54 : vector<1x32x1xf32> to vector<32x1xf32>
    %56 = vector.broadcast %55 : vector<32x1xf32> to vector<32x256xf32>
    %57 = arith.mulf %26, %56 : vector<32x256xf32>
    %58 = arith.addf %53, %57 : vector<32x256xf32>
    %59 = vector.extract_strided_slice %2 {offsets = [5, 0, 0], sizes = [1, 32, 1], strides = [1, 1, 1]} : vector<9x32x1xf32> to vector<1x32x1xf32>
    %60 = vector.shape_cast %59 : vector<1x32x1xf32> to vector<32x1xf32>
    %61 = vector.broadcast %60 : vector<32x1xf32> to vector<32x256xf32>
    %62 = arith.mulf %32, %61 : vector<32x256xf32>
    %63 = arith.addf %58, %62 : vector<32x256xf32>
    %64 = arith.addf %49, %63 : vector<32x256xf32>
    %65 = vector.extract_strided_slice %2 {offsets = [6, 0, 0], sizes = [1, 32, 1], strides = [1, 1, 1]} : vector<9x32x1xf32> to vector<1x32x1xf32>
    %66 = vector.shape_cast %65 : vector<1x32x1xf32> to vector<32x1xf32>
    %67 = vector.broadcast %66 : vector<32x1xf32> to vector<32x256xf32>
    %68 = arith.mulf %29, %67 : vector<32x256xf32>
    %69 = vector.extract_strided_slice %2 {offsets = [7, 0, 0], sizes = [1, 32, 1], strides = [1, 1, 1]} : vector<9x32x1xf32> to vector<1x32x1xf32>
    %70 = vector.shape_cast %69 : vector<1x32x1xf32> to vector<32x1xf32>
    %71 = vector.broadcast %70 : vector<32x1xf32> to vector<32x256xf32>
    %72 = arith.mulf %26, %71 : vector<32x256xf32>
    %73 = arith.addf %68, %72 : vector<32x256xf32>
    %74 = vector.extract_strided_slice %2 {offsets = [8, 0, 0], sizes = [1, 32, 1], strides = [1, 1, 1]} : vector<9x32x1xf32> to vector<1x32x1xf32>
    %75 = vector.shape_cast %74 : vector<1x32x1xf32> to vector<32x1xf32>
    %76 = vector.broadcast %75 : vector<32x1xf32> to vector<32x256xf32>
    %77 = arith.mulf %32, %76 : vector<32x256xf32>
    %78 = arith.addf %73, %77 : vector<32x256xf32>
    %c240_i32 = arith.constant 240 : i32
    %79 = tpu.dynamic_rotate %78 by %c240_i32 dim 1 : vector<32x256xf32>, i32 -> vector<32x256xf32>
    %80 = vector.broadcast %11 : vector<1x256xf32> to vector<32x256xf32>
    %81 = arith.mulf %79, %80 : vector<32x256xf32>
    %82 = arith.addf %64, %81 : vector<32x256xf32>
    %83 = vector.broadcast %3 : vector<32x1xf32> to vector<32x256xf32>
    %84 = arith.addf %82, %83 : vector<32x256xf32>
    %cst_34 = arith.constant 0.000000e+00 : f32
    %cst_35 = arith.constant 6.000000e+00 : f32
    %85 = vector.broadcast %cst_34 : f32 to vector<32x256xf32>
    %86 = arith.maximumf %85, %84 : vector<32x256xf32>
    %87 = vector.broadcast %cst_35 : f32 to vector<32x256xf32>
    %88 = arith.minimumf %87, %86 : vector<32x256xf32>
    %cst_36 = arith.constant dense<0.000000e+00> : vector<32xf32>
    %89 = vector.multi_reduction <add>, %88, %cst_36 [1] : vector<32x256xf32> to vector<32xf32>
    %90 = vector.shape_cast %89 : vector<32xf32> to vector<32x1xf32>
    %cst_37 = arith.constant 3.906250e-03 : f32
    %91 = vector.broadcast %cst_37 : f32 to vector<32x1xf32>
    %92 = arith.mulf %90, %91 : vector<32x1xf32>
    %93 = vector.broadcast %92 : vector<32x1xf32> to vector<32x8xf32>
    %94 = arith.mulf %12, %93 : vector<32x8xf32>
    %cst_38 = arith.constant dense<0.000000e+00> : vector<8xf32>
    %95 = vector.multi_reduction <add>, %94, %cst_38 [0] : vector<32x8xf32> to vector<8xf32>
    %96 = vector.shape_cast %95 : vector<8xf32> to vector<1x8xf32>
    %97 = arith.addf %96, %13 : vector<1x8xf32>
    %cst_39 = arith.constant 0.000000e+00 : f32
    %98 = vector.broadcast %cst_39 : f32 to vector<1x8xf32>
    %99 = arith.maximumf %97, %98 : vector<1x8xf32>
    %100 = vector.broadcast %99 : vector<1x8xf32> to vector<32x8xf32>
    %101 = arith.mulf %14, %100 : vector<32x8xf32>
    %cst_40 = arith.constant dense<0.000000e+00> : vector<32xf32>
    %102 = vector.multi_reduction <add>, %101, %cst_40 [1] : vector<32x8xf32> to vector<32xf32>
    %103 = vector.shape_cast %102 : vector<32xf32> to vector<32x1xf32>
    %104 = arith.addf %103, %15 : vector<32x1xf32>
    %105 = arith.negf %104 : vector<32x1xf32>
    %106 = math.exp %105 : vector<32x1xf32>
    %cst_41 = arith.constant 1.000000e+00 : f32
    %107 = vector.broadcast %cst_41 : f32 to vector<32x1xf32>
    %108 = arith.addf %107, %106 : vector<32x1xf32>
    %109 = arith.divf %107, %108 : vector<32x1xf32>
    %110 = vector.broadcast %109 : vector<32x1xf32> to vector<32x256xf32>
    %111 = arith.mulf %88, %110 : vector<32x256xf32>
    %cst_42 = arith.constant dense<0.000000e+00> : vector<8x256xf32>
    %112 = tpu.matmul %16, %111, %cst_42 {dimension_numbers = #tpu.dot_dimension_numbers<[1], [0], [0], [1], [0, 0, 1, 1], [], []>} : vector<8x32xf32>, vector<32x256xf32>, vector<8x256xf32> -> vector<8x256xf32>
    %113 = vector.broadcast %17 : vector<8x1xf32> to vector<8x256xf32>
    %114 = arith.addf %112, %113 : vector<8x256xf32>
    %115 = arith.addf %114, %19 : vector<8x256xf32>
    %c0_43 = arith.constant 0 : index
    %c0_44 = arith.constant 0 : index
    %c0_45 = arith.constant 0 : index
    %116 = vector.load %arg13[%c0_43, %c0_44, %c0_45] : memref<1x8x256xf32, #tpu.memory_space<vmem>>, vector<1x8x256xf32>
    %117 = vector.shape_cast %116 : vector<1x8x256xf32> to vector<8x256xf32>
    %118 = vector.shape_cast %115 : vector<8x256xf32> to vector<1x8x256xf32>
    tpu.vector_store %arg13[%c0_43, %c0_44, %c0_45], %118 {strides = array<i32>} : memref<1x8x256xf32, #tpu.memory_space<vmem>>, vector<1x8x256xf32>,
    return
  }
  func.func @transform_0(%arg0: i32) -> (i32, i32, i32) {
    %c0_i32 = arith.constant 0 : i32
    %c0_i32_0 = arith.constant 0 : i32
    %c0_i32_1 = arith.constant 0 : i32
    return %arg0, %c0_i32, %c0_i32_0 : i32, i32, i32
  }
  func.func @transform_1(%arg0: i32) -> (i32, i32) {
    %c0_i32 = arith.constant 0 : i32
    %c0_i32_0 = arith.constant 0 : i32
    %c0_i32_1 = arith.constant 0 : i32
    return %c0_i32, %c0_i32_0 : i32, i32
  }
  func.func @transform_2(%arg0: i32) -> (i32, i32) {
    %c0_i32 = arith.constant 0 : i32
    %c0_i32_0 = arith.constant 0 : i32
    %c0_i32_1 = arith.constant 0 : i32
    return %c0_i32, %c0_i32_0 : i32, i32
  }
  func.func @transform_3(%arg0: i32) -> (i32, i32, i32) {
    %c0_i32 = arith.constant 0 : i32
    %c0_i32_0 = arith.constant 0 : i32
    %c0_i32_1 = arith.constant 0 : i32
    %c0_i32_2 = arith.constant 0 : i32
    return %c0_i32, %c0_i32_0, %c0_i32_1 : i32, i32, i32
  }
  func.func @transform_4(%arg0: i32) -> (i32, i32) {
    %c0_i32 = arith.constant 0 : i32
    %c0_i32_0 = arith.constant 0 : i32
    %c0_i32_1 = arith.constant 0 : i32
    return %c0_i32, %c0_i32_0 : i32, i32
  }
  func.func @transform_5(%arg0: i32) -> (i32, i32, i32) {
    %c0_i32 = arith.constant 0 : i32
    %c0_i32_0 = arith.constant 0 : i32
    %c0_i32_1 = arith.constant 0 : i32
    %c0_i32_2 = arith.constant 0 : i32
    return %c0_i32, %c0_i32_0, %c0_i32_1 : i32, i32, i32
  }
  func.func @transform_6(%arg0: i32) -> (i32, i32) {
    %c0_i32 = arith.constant 0 : i32
    %c0_i32_0 = arith.constant 0 : i32
    %c0_i32_1 = arith.constant 0 : i32
    return %c0_i32, %c0_i32_0 : i32, i32
  }
  func.func @transform_7(%arg0: i32) -> (i32, i32) {
    %c0_i32 = arith.constant 0 : i32
    %c0_i32_0 = arith.constant 0 : i32
    %c0_i32_1 = arith.constant 0 : i32
    return %c0_i32, %c0_i32_0 : i32, i32
  }
  func.func @transform_8(%arg0: i32) -> (i32, i32) {
    %c0_i32 = arith.constant 0 : i32
    %c0_i32_0 = arith.constant 0 : i32
    %c0_i32_1 = arith.constant 0 : i32
    return %c0_i32, %c0_i32_0 : i32, i32
  }
  func.func @transform_9(%arg0: i32) -> (i32, i32) {
    %c0_i32 = arith.constant 0 : i32
    %c0_i32_0 = arith.constant 0 : i32
    %c0_i32_1 = arith.constant 0 : i32
    return %c0_i32, %c0_i32_0 : i32, i32
  }
  func.func @transform_10(%arg0: i32) -> (i32, i32) {
    %c0_i32 = arith.constant 0 : i32
    %c0_i32_0 = arith.constant 0 : i32
    %c0_i32_1 = arith.constant 0 : i32
    return %c0_i32, %c0_i32_0 : i32, i32
  }
  func.func @transform_11(%arg0: i32) -> (i32, i32) {
    %c0_i32 = arith.constant 0 : i32
    %c0_i32_0 = arith.constant 0 : i32
    %c0_i32_1 = arith.constant 0 : i32
    return %c0_i32, %c0_i32_0 : i32, i32
  }
  func.func @transform_12(%arg0: i32) -> (i32, i32, i32) {
    %c0_i32 = arith.constant 0 : i32
    %c0_i32_0 = arith.constant 0 : i32
    %c0_i32_1 = arith.constant 0 : i32
    return %arg0, %c0_i32, %c0_i32_0 : i32, i32, i32
  }
}

</mosaic_0001>

<bundles_post_ra>
// kernel: tpu_custom_call.1
= control target key start
LH: loop header
LB: loop body
LE: loop exit
PB: predicated region body
PF: predicated region fallthrough
CT: control target
= control target key end

     0   :  { %s2369_s0 = inlined_call_operand.vmem [shape: f32[2,8,256], index: 0, kind: input, shape index: {}]   ;;  %s2370_s1 = inlined_call_operand.vmem [shape: f32[32,8], index: 1, kind: input, shape index: {}]   ;;  %s2371_s2 = inlined_call_operand.vmem [shape: f32[32,1], index: 2, kind: input, shape index: {}]   ;;  %s2372_s3 = inlined_call_operand.vmem [shape: f32[9,32,1], index: 3, kind: input, shape index: {}]   ;;  %s2373_s4 = inlined_call_operand.vmem [shape: f32[32,1], index: 4, kind: input, shape index: {}]   ;;  %s2374_s5 = inlined_call_operand.vmem [shape: f32[4,1,256], index: 5, kind: input, shape index: {}]   ;;  %s2375_s6 = inlined_call_operand.vmem [shape: f32[32,8], index: 6, kind: input, shape index: {}]   ;;  %s2376_s7 = inlined_call_operand.vmem [shape: f32[1,8], index: 7, kind: input, shape index: {}]   ;;  %s2377_s8 = inlined_call_operand.vmem [shape: f32[32,8], index: 8, kind: input, shape index: {}]   ;;  %s2378_s9 = inlined_call_operand.vmem [shape: f32[32,1], index: 9, kind: input, shape index: {}]   ;;  %s2379_s10 = inlined_call_operand.vmem [shape: f32[8,32], index: 10, kind: input, shape index: {}]   ;;  %s2380_s11 = inlined_call_operand.vmem [shape: f32[8,1], index: 11, kind: input, shape index: {}]   ;;  %s2381_s12 = inlined_call_operand.hbm [shape: f32[2,8,256], index: 12, kind: output, shape index: {}]  }
   0x1   :  { %2383 = sst [smem:[#allocation7_spill]] %s2369_s0 }
   0x2   :  { %17 = vsyncpa [#allocation3], 0 }
   0x3   :  { %19 = vsyncpa [#allocation3 + $0x1], 0  ;;  %s1654_s21 = smov 0   ;;  %s1656_s22 = smov 0  }
   0x4   :  { %s1658_s23 = smov 0   ;;  %s1660_s24 = smov 0  }
   0x5 LB: > { %2384 = sst [smem:[#allocation5_spill]] %s1576_s23  ;;  %s1675_s25 = sadd.s32 4294967295, %s1580_s24   ;;  %s1580_s24 = sphi %s1660_s24, %s2393_s24   ;;  %s1576_s23 = sphi %s1658_s23, %s2390_s23   ;;  %s1572_s22 = sphi %s1656_s22, %s2392_s22   ;;  %s1568_s21 = sphi %s1654_s21, %s2391_s21  }
   0x6   : > { %s1429_s26 = sadd.s32 4294967294, %s1580_s24   ;;  %s1679_s27 = sadd.s32 1, %s1580_s24  }
   0x7   : > { %s289_s28 = sadd.s32 1, %s1576_s23  ;;  %s286_s29 = ssub.s32 %s1580_s24, %s1679_s27 }
   0x8   : > { %p299_p0 = scmp.ne.s32.totalorder %s1576_s23, %s1572_s22  ;;  %p287_p1 = scmp.eq.s32.totalorder %s286_s29, 0 }
   0x9   : > { %p300_p2 = scmp.eq.s32.totalorder %s1675_s25, 1  ;;  %p305_p3 = scmp.ne.s32.totalorder %s1572_s22, %s1568_s21 }
   0xa   : > { %p306_p4 = scmp.eq.s32.totalorder %s1429_s26, 1  ;;  %p1432_p7 = scmp.ge.s32.totalorder %s1580_s24, 1 }
   0xb   : > { %s1690_s30 = scalar_select %p287_p1, %s1576_s23, %s289_s28  }
   0xc   : > { %p1692_p5 = por %p300_p2, %p299_p0  ;;  %p1696_p6 = por %p306_p4, %p305_p3 }
   0xd   : > { %2385 = sst [smem:[#allocation6_spill]] %s1690_s30  ;;  %p365_p8 = scmp.lt.s32.totalorder %s1580_s24, 3 }
   0xf   : > { %p366_p9 = pnand %p1432_p7, %p365_p8 }
  0x10   : > { %p407_p10 = scmp.lt.s32.totalorder (!%p366_p9), %s1675_s25, 1  ;;  %s2388_s0 = sld [smem:[#allocation7_spill]] (!%p366_p9) }
  0x11   : > { %369 = sbr.rel (%p366_p9) target bundleno = 1215 (0x4bf), region = 68  ;;  %s1584_s18 = smov (!%p366_p9), 127  }
  0x12   : > { %s1586_s19 = smov (!%p366_p9), 16   ;;  %s1587_s30 = smov (!%p366_p9), 112  }
  0x16   : > { %v1582_v0 = vmov 0.0   ;;  %v416_v1 = vld [vmem:[%s2371_s2] sm:$0xff]  ;;  %s408_s17 = scalar_select %p407_p10, %s1675_s25, 1  ;;  %v1583_v2 = vmov 0   ;;  %v418_v3 = vld [vmem:[%s2371_s2 + $0x10] sm:$0xff]  ;;  %v417_v4 = vld [vmem:[%s2371_s2 + $0x8] sm:$0xff]  ;;  %v623_v36 = vlaneseq }
  0x17   : > { %581 = vmatprep.mubr.f32.mxu0 %v1582_v0  ;;  %1344 = vmatprep.mubr.f32.mxu1 %v1582_v0  ;;  %v419_v5 = vld [vmem:[%s2371_s2 + $0x18] sm:$0xff]  ;;  %v412_v8 = vld [vmem:[%s2370_s1] sm:$0xff]  ;;  %vm504_vm0 = vcmask 64512   ;;  %v421_v10 = vld [vmem:[%s2372_s3 + $0x8] sm:$0xff]  ;;  %vm1276_vm5 = vcmask 261120  }
  0x18   : > { %1500 = vset.pattern.permute.xlu0 %v1583_v2  ;;  %1501 = vset.pattern.permute.xlu1 %v1583_v2  ;;  %s1453_s20 = sshll.u32 %s408_s17, 4  ;;  %v420_v9 = vld [vmem:[%s2372_s3] sm:$0xff]  ;;  %v413_v11 = vld [vmem:[%s2370_s1 + $0x8] sm:$0xff]  ;;  %v414_v14 = vld [vmem:[%s2370_s1 + $0x10] sm:$0xff]  ;;  %v624_v37 = vshrl.u32 %v623_v36, 7  ;;  %s1585_s17 = smov 1  }
  0x19   : > { %486 = vperm.xlu0 %1500, %v416_v1   ;;  %496 = vperm.xlu1 %1501, %v418_v3   ;;  %s1716_s15 = scalar_lea.vmem %s2388_s0, %s1453_s20  ;;  %v424_v12 = vld [vmem:[%s2372_s3 + $0x20] sm:$0xff]  ;;  %v425_v13 = vld [vmem:[%s2372_s3 + $0x28] sm:$0xff]  ;;  %v422_v15 = vld [vmem:[%s2372_s3 + $0x10] sm:$0xff] }
  0x1a   : > { %v483_v6 = vld [vmem:[%s1716_s15 + $0x8] sm:$0xff]  ;;  %v482_v7 = vld [vmem:[%s1716_s15] sm:$0xff]  ;;  %v426_v16 = vld [vmem:[%s2372_s3 + $0x30] sm:$0xff]  ;;  %v1812_v39 = vsub.s32 0, %v624_v37  ;;  %v1820_v45 = vsub.s32 1, %v624_v37 }
  0x1b   : > { %547 = vmatprep.subr.mxu0 %v483_v6  ;;  %v415_v17 = vld [vmem:[%s2370_s1 + $0x18] sm:$0xff]  ;;  %v428_v18 = vld [vmem:[%s2372_s3 + $0x40] sm:$0xff]  ;;  %v429_v19 = vld [vmem:[%s2372_s3 + $0x48] sm:$0xff] }
  0x1c   : > { %548 = vmatpush1.msra.mxu0 %v482_v7  ;;  %v444_v20 = vld [vmem:[%s2372_s3 + $0xc0] sm:$0xff]  ;;  %v445_v21 = vld [vmem:[%s2372_s3 + $0xc8] sm:$0xff]  ;;  %v423_v24 = vld [vmem:[%s2372_s3 + $0x18] sm:$0xff] }
  0x1d   : > { %491 = vperm.xlu0 %1500, %v417_v4   ;;  %501 = vperm.xlu1 %1501, %v419_v5   ;;  %v448_v22 = vld [vmem:[%s2372_s3 + $0xe0] sm:$0xff]  ;;  %v449_v23 = vld [vmem:[%s2372_s3 + $0xe8] sm:$0xff]  ;;  %v427_v25 = vld [vmem:[%s2372_s3 + $0x38] sm:$0xff] }
  0x1e   : > { %1439 = vmatmul.mubr.msk.f32.vlgmr.msra.gmra.mxu0 %vm504_vm0, %v412_v8  ;;  %v430_v26 = vld [vmem:[%s2372_s3 + $0x50] sm:$0xff]  ;;  %v452_v29 = vld [vmem:[%s2372_s3 + $0x100] sm:$0xff]  ;;  %v453_v30 = vld [vmem:[%s2372_s3 + $0x108] sm:$0xff] }
  0x1f   : > { %587 = vmatprep.mubr.f32.mxu0 %v1582_v0  ;;  %v446_v27 = vld [vmem:[%s2372_s3 + $0xd0] sm:$0xff]  ;;  %v431_v31 = vld [vmem:[%s2372_s3 + $0x58] sm:$0xff]  ;;  %v1436_v41 = vld [vmem:[%s2374_s5 + $0x2] sm:$0x3] }
  0x20   : > { %v450_v28 = vld [vmem:[%s2372_s3 + $0xf0] sm:$0xff]  ;;  %v447_v32 = vld [vmem:[%s2372_s3 + $0xd8] sm:$0xff]  ;;  %v460_v43 = vld [vmem:[%s2374_s5] sm:$0x3]  ;;  %v1823_v48 = vrot.slane %v1436_v41, %v1812_v39  ;;  %v676_v56 = vrot.slane %v1436_v41, %v1820_v45 }
  0x21   : > { %714 = vperm.xlu0 %1500, %v420_v9   ;;  %719 = vperm.xlu1 %1501, %v421_v10   ;;  %v451_v33 = vld [vmem:[%s2372_s3 + $0xf8] sm:$0xff]  ;;  %v454_v34 = vld [vmem:[%s2372_s3 + $0x110] sm:$0xff]  ;;  %v626_v51 = vrot.slane %v460_v43, %v1812_v39  ;;  %v630_v63 = vrot.slane %v460_v43, %v1820_v45  ;;  %v437_v37 = vld [vmem:[%s2372_s3 + $0x88] sm:$0xff] }
  0x22   : > { %1440 = vmatmul.mubr.msk.f32.gmra.mxu0 %vm504_vm0, %v413_v11  ;;  %v455_v35 = vld [vmem:[%s2372_s3 + $0x118] sm:$0xff]  ;;  %v434_v41 = vld [vmem:[%s2372_s3 + $0x70] sm:$0xff]  ;;  %v440_v43 = vld [vmem:[%s2372_s3 + $0xa0] sm:$0xff] }
  0x23   : > { %593 = vmatprep.mubr.f32.mxu0 %v1582_v0 }
  0x25   : > { %742 = vperm.xlu0 %1500, %v424_v12   ;;  %747 = vperm.xlu1 %1501, %v425_v13  }
  0x26   : > { %1441 = vmatmul.mubr.msk.f32.gmra.mxu0 %vm504_vm0, %v414_v14 }
  0x27   : > { %599 = vmatprep.mubr.f32.mxu0 %v1582_v0 }
  0x29   : > { %724 = vperm.xlu0 %1500, %v422_v15   ;;  %752 = vperm.xlu1 %1501, %v426_v16  }
  0x2a   : > { %1442 = vmatmul.mubr.msk.f32.gmra.mxu0 %vm504_vm0, %v415_v17 }
  0x2d   : > { %778 = vperm.xlu0 %1500, %v428_v18   ;;  %783 = vperm.xlu1 %1501, %v429_v19  }
  0x31   : > { %966 = vperm.xlu0 %1500, %v444_v20   ;;  %971 = vperm.xlu1 %1501, %v445_v21  }
  0x35   : > { %994 = vperm.xlu0 %1500, %v448_v22   ;;  %999 = vperm.xlu1 %1501, %v449_v23  }
  0x39   : > { %729 = vperm.xlu0 %1500, %v423_v24   ;;  %757 = vperm.xlu1 %1501, %v427_v25  }
  0x3d   : > { %788 = vperm.xlu0 %1500, %v430_v26   ;;  %976 = vperm.xlu1 %1501, %v446_v27  }
  0x41   : > { %1004 = vperm.xlu0 %1500, %v450_v28   ;;  %1030 = vperm.xlu1 %1501, %v452_v29  }
  0x45   : > { %1035 = vperm.xlu0 %1500, %v453_v30   ;;  %793 = vperm.xlu1 %1501, %v431_v31  }
  0x49   : > { %981 = vperm.xlu0 %1500, %v447_v32   ;;  %1009 = vperm.xlu1 %1501, %v451_v33  }
  0x4d   : > { %1040 = vperm.xlu0 %1500, %v454_v34   ;;  %1045 = vperm.xlu1 %1501, %v455_v35   ;;  %v433_v34 = vld [vmem:[%s2372_s3 + $0x68] sm:$0xff]  ;;  %v432_v35 = vld [vmem:[%s2372_s3 + $0x60] sm:$0xff] }
  0x94   : > { %v487_v38 = vpop.permute.xlu0 %486  ;;  %v497_v0 = vpop.permute.xlu1 %496 }
  0x98   : > { %v492_v49 = vpop.permute.xlu0 %491  ;;  %v502_v15 = vpop.permute.xlu1 %501 }
  0xde   : > { %v583_v40 = vpop.f32.mrf.mxu0 }
  0xdf   : > { %v584_v42 = vadd.f32 %v583_v40, %v487_v38  ;;  %v438_v40 = vld [vmem:[%s2372_s3 + $0x90] sm:$0xff] }
  0xe0   : > { %v585_v44 = vpop.f32.mrf.mxu0 }
  0xe1   : > { %v606_v46 = vmax.f32 %v584_v42, 0.0  ;;  %v586_v47 = vadd.f32 %v585_v44, %v487_v38  ;;  %v436_v38 = vld [vmem:[%s2372_s3 + $0x80] sm:$0xff]  ;;  %v441_v42 = vld [vmem:[%s2372_s3 + $0xa8] sm:$0xff]  ;;  %v1904_v44 = vpop.permute.xlu1 %719 }
  0xe2   : > { %v589_v50 = vpop.f32.mrf.mxu0 }
  0xe3   : > { %v1826_v52 = vmin.f32 %v606_v46, 6.0  ;;  %v607_v53 = vmax.f32 %v586_v47, 0.0  ;;  %v590_v54 = vadd.f32 %v589_v50, %v492_v49  ;;  %v715_v46 = vpop.permute.xlu0 %714  ;;  %v439_v47 = vld [vmem:[%s2372_s3 + $0x98] sm:$0xff] }
  0xe4   : > { %v591_v55 = vpop.f32.mrf.mxu0 }
  0xe5   : > { %v1829_v57 = vmin.f32 %v607_v53, 6.0  ;;  %v608_v58 = vmax.f32 %v590_v54, 0.0  ;;  %v592_v59 = vadd.f32 %v591_v55, %v492_v49  ;;  %v679_v60 = vmul.f32 %v1823_v48, %v1826_v52  ;;  %v443_v49 = vld [vmem:[%s2372_s3 + $0xb8] sm:$0xff]  ;;  %v1915_v50 = vpop.permute.xlu1 %747  ;;  %v457_v54 = vld [vmem:[%s2373_s4 + $0x8] sm:$0xff]  ;;  %v456_v55 = vld [vmem:[%s2373_s4] sm:$0xff] }
  0xe6   : > { %v595_v61 = vpop.f32.mrf.mxu0  ;;  %v633_v62 = vmul.f32 %v626_v51, %v1826_v52 }
  0xe7   : > { %687 = vrot.lane.b32.xlu1 %v679_v60, %s1584_s18  ;;  %v1837_v2 = vmin.f32 %v608_v58, 6.0  ;;  %v609_v3 = vmax.f32 %v592_v59, 0.0  ;;  %v596_v4 = vadd.f32 %v595_v61, %v497_v0  ;;  %v680_v5 = vmul.f32 %v676_v56, %v1829_v57  ;;  %v743_v53 = vpop.permute.xlu0 %742  ;;  %v458_v59 = vld [vmem:[%s2373_s4 + $0x10] sm:$0xff] }
  0xe8   : > { %641 = vrot.lane.b32.xlu0 %v633_v62, %s1585_s17  ;;  %v597_v1 = vpop.f32.mrf.mxu0  ;;  %v634_v7 = vmul.f32 %v630_v63, %v1829_v57 }
  0xe9   : > { %v598_v6 = vadd.f32 %v597_v1, %v497_v0  ;;  %v1843_v9 = vmin.f32 %v609_v3, 6.0  ;;  %v610_v10 = vmax.f32 %v596_v4, 0.0  ;;  %v635_v11 = vmul.f32 %v626_v51, %v1837_v2 }
  0xea   : > { %v601_v8 = vpop.f32.mrf.mxu0  ;;  %v681_v13 = vmul.f32 %v1823_v48, %v1837_v2 }
  0xeb   : > { %695 = vrot.lane.b32.xlu1 %v680_v5, %s1584_s18  ;;  %v611_v12 = vmax.f32 %v598_v6, 0.0  ;;  %v1850_v16 = vmin.f32 %v610_v10, 6.0  ;;  %v602_v17 = vadd.f32 %v601_v8, %v502_v15  ;;  %v636_v18 = vmul.f32 %v630_v63, %v1843_v9  ;;  %v1928_v58 = vpop.permute.xlu0 %724 }
  0xec   : > { %649 = vrot.lane.b32.xlu0 %v634_v7, %s1585_s17  ;;  %v603_v14 = vpop.f32.mrf.mxu0  ;;  %v682_v21 = vmul.f32 %v676_v56, %v1843_v9 }
  0xed   : > { %v1853_v19 = vmin.f32 %v611_v12, 6.0  ;;  %v604_v20 = vadd.f32 %v603_v14, %v502_v15  ;;  %v637_v22 = vmul.f32 %v626_v51, %v1850_v16  ;;  %v612_v24 = vmax.f32 %v602_v17, 0.0 }
  0xee   : > { %v683_v26 = vmul.f32 %v1823_v48, %v1850_v16 }
  0xef   : > { %643 = vrot.lane.b32.xlu1 %v635_v11, %s1585_s17  ;;  %v638_v23 = vmul.f32 %v630_v63, %v1853_v19  ;;  %v613_v25 = vmax.f32 %v604_v20, 0.0  ;;  %v684_v27 = vmul.f32 %v676_v56, %v1853_v19  ;;  %v1865_v28 = vmin.f32 %v612_v24, 6.0  ;;  %v779_v61 = vpop.permute.xlu0 %778 }
  0xf0   : > { %689 = vrot.lane.b32.xlu0 %v681_v13, %s1584_s18 }
  0xf1   : > { %v1867_v29 = vmin.f32 %v613_v25, 6.0  ;;  %v639_v30 = vmul.f32 %v626_v51, %v1865_v28  ;;  %v685_v33 = vmul.f32 %v1823_v48, %v1865_v28  ;;  %v435_v48 = vld [vmem:[%s2372_s3 + $0x78] sm:$0xff]  ;;  %v442_v51 = vld [vmem:[%s2372_s3 + $0xb0] sm:$0xff] }
  0xf3   : > { %651 = vrot.lane.b32.xlu1 %v636_v18, %s1585_s17  ;;  %v640_v31 = vmul.f32 %v630_v63, %v1867_v29  ;;  %v686_v32 = vmul.f32 %v676_v56, %v1867_v29  ;;  %v1926_v56 = vpop.permute.xlu1 %752  ;;  %v967_v63 = vpop.permute.xlu0 %966  ;;  %v1962_v18 = vand.u32 127, %v623_v36 }
  0xf4   : > { %697 = vrot.lane.b32.xlu0 %v682_v21, %s1584_s18 }
  0xf5   : > { %vm703_vm1 = vcmp.lt.s32.totalorder %v1962_v18, 127  ;;  %vm659_vm2 = vcmp.lt.s32.totalorder %v1962_v18, 1  ;;  %vm828_vm3 = vcmp.lt.s32.totalorder %v1962_v18, 16  ;;  %vm1080_vm4 = vcmp.lt.s32.totalorder %v1962_v18, 112 }
  0xf7   : > { %645 = vrot.lane.b32.xlu1 %v637_v22, %s1585_s17  ;;  %v1933_v60 = vpop.permute.xlu1 %783  ;;  %v995_v1 = vpop.permute.xlu0 %994 }
  0xf8   : > { %653 = vrot.lane.b32.xlu0 %v638_v23, %s1585_s17 }
  0xfb   : > { %691 = vrot.lane.b32.xlu1 %v683_v26, %s1584_s18  ;;  %v1935_v62 = vpop.permute.xlu1 %971  ;;  %v1941_v4 = vpop.permute.xlu0 %729 }
  0xfc   : > { %699 = vrot.lane.b32.xlu0 %v684_v27, %s1584_s18 }
  0xff   : > { %647 = vrot.lane.b32.xlu1 %v639_v30, %s1585_s17  ;;  %v1937_v0 = vpop.permute.xlu1 %999  ;;  %v1945_v6 = vpop.permute.xlu0 %788  ;;  %v760_v30 = vmul.f32 %v743_v53, %v1826_v52 }
 0x100   : > { %655 = vrot.lane.b32.xlu0 %v640_v31, %s1585_s17 }
 0x103   : > { %701 = vrot.lane.b32.xlu1 %v686_v32, %s1584_s18  ;;  %v1939_v3 = vpop.permute.xlu1 %757  ;;  %v1947_v8 = vpop.permute.xlu0 %1004 }
 0x104   : > { %693 = vrot.lane.b32.xlu0 %v685_v33, %s1584_s18  ;;  %s404_s18 = sand.u32 1, %s1572_s22  }
 0x105   : > { %s1433_s17 = sshll.u32 %s404_s18, 4  ;;  %s1356_s29 = scalar_lea.sflag [#allocation3], %s404_s18 }
 0x107   : > { %863 = vperm.xlu1 %1501, %v433_v34   ;;  %v1943_v5 = vpop.permute.xlu1 %976  ;;  %v1951_v11 = vpop.permute.xlu0 %1035  ;;  %v761_v34 = vmul.f32 %v743_v53, %v1829_v57 }
 0x108   : > { %858 = vperm.xlu0 %1500, %v432_v35  }
 0x10b   : > { %891 = vperm.xlu1 %1501, %v437_v37   ;;  %v1031_v7 = vpop.permute.xlu1 %1030  ;;  %v1955_v13 = vpop.permute.xlu0 %981 }
 0x10c   : > { %886 = vperm.xlu0 %1500, %v436_v38  }
 0x10f   : > { %896 = vperm.xlu1 %1501, %v438_v40   ;;  %v1949_v10 = vpop.permute.xlu1 %793  ;;  %v1959_v15 = vpop.permute.xlu0 %1040 }
 0x110   : > { %868 = vperm.xlu0 %1500, %v434_v41  }
 0x113   : > { %927 = vperm.xlu1 %1501, %v441_v42   ;;  %v1953_v12 = vpop.permute.xlu1 %1009 }
 0x114   : > { %922 = vperm.xlu0 %1500, %v440_v43  }
 0x117   : > { %901 = vperm.xlu1 %1501, %v439_v47   ;;  %v1957_v14 = vpop.permute.xlu1 %1045 }
 0x118   : > { %873 = vperm.xlu0 %1500, %v435_v48  }
 0x11b   : > { %937 = vperm.xlu1 %1501, %v443_v49   ;;  %v1012_v49 = vmul.f32 %v995_v1, %v1826_v52 }
 0x11c   : > { %932 = vperm.xlu0 %1500, %v442_v51  }
 0x11f   : > { %1123 = vperm.xlu1 %1501, %v457_v54   ;;  %v762_v54 = vmul.f32 %v1915_v50, %v1837_v2 }
 0x120   : > { %1118 = vperm.xlu0 %1500, %v456_v55  }
 0x124   : > { %1128 = vperm.xlu0 %1500, %v458_v59  }
 0x159   : > { %v688_v17 = vpop.permute.xlu1 %687 }
 0x15a   : > { %v642_v20 = vpop.permute.xlu0 %641 }
 0x15d   : > { %v696_v21 = vpop.permute.xlu1 %695 }
 0x15e   : > { %v650_v22 = vpop.permute.xlu0 %649  ;;  %v1968_v23 = vsel %vm703_vm1, %v688_v17, %v696_v21  ;;  %v1985_v35 = vsel %vm703_vm1, %v696_v21, %v688_v17 }
 0x15f   : > { %v1972_v24 = vsel %vm659_vm2, %v642_v20, %v650_v22  ;;  %v1976_v25 = vsel %vm659_vm2, %v650_v22, %v642_v20  ;;  %v796_v32 = vmul.f32 %v779_v61, %v1968_v23  ;;  %v797_v47 = vmul.f32 %v779_v61, %v1985_v35 }
 0x160   : > { %v732_v36 = vmul.f32 %v715_v46, %v1976_v25  ;;  %v733_v26 = vmul.f32 %v715_v46, %v1972_v24  ;;  %v984_v37 = vmul.f32 %v967_v63, %v1976_v25  ;;  %v985_v51 = vmul.f32 %v967_v63, %v1972_v24 }
 0x161   : > { %v644_v27 = vpop.permute.xlu1 %643  ;;  %v1013_v22 = vmul.f32 %v995_v1, %v1829_v57 }
 0x162   : > { %v690_v31 = vpop.permute.xlu0 %689  ;;  %v768_v33 = vadd.f32 %v760_v30, %v732_v36  ;;  %v769_v41 = vadd.f32 %v761_v34, %v733_v26  ;;  %v1020_v17 = vadd.f32 %v1012_v49, %v984_v37  ;;  %v1048_v36 = vmul.f32 %v1031_v7, %v1968_v23 }
 0x163   : > { %v763_v26 = vmul.f32 %v1915_v50, %v1843_v9  ;;  %v1021_v30 = vadd.f32 %v1013_v22, %v985_v51  ;;  %v1014_v50 = vmul.f32 %v1937_v0, %v1837_v2 }
 0x164   : > { %v804_v40 = vadd.f32 %v796_v32, %v768_v33  ;;  %v805_v61 = vadd.f32 %v797_v47, %v769_v41  ;;  %v1056_v33 = vadd.f32 %v1048_v36, %v1020_v17  ;;  %v764_v47 = vmul.f32 %v1926_v56, %v1850_v16 }
 0x165   : > { %v652_v38 = vpop.permute.xlu1 %651  ;;  %v1015_v17 = vmul.f32 %v1937_v0, %v1843_v9 }
 0x166   : > { %v1990_v42 = vsel %vm659_vm2, %v644_v27, %v652_v38  ;;  %v1994_v43 = vsel %vm659_vm2, %v652_v38, %v644_v27  ;;  %v698_v46 = vpop.permute.xlu0 %697  ;;  %812 = vrot.lane.b32.xlu0 %v804_v40, %s1586_s19  ;;  %v1049_v38 = vmul.f32 %v1031_v7, %v1985_v35 }
 0x167   : > { %v734_v48 = vmul.f32 %v1904_v44, %v1994_v43  ;;  %v2004_v53 = vsel %vm703_vm1, %v690_v31, %v698_v46  ;;  %v735_v55 = vmul.f32 %v1904_v44, %v1990_v42  ;;  %v2019_v44 = vsel %vm703_vm1, %v698_v46, %v690_v31 }
 0x168   : > { %v798_v63 = vmul.f32 %v1933_v60, %v2004_v53  ;;  %v986_v1 = vmul.f32 %v1935_v62, %v1994_v43  ;;  %v799_v31 = vmul.f32 %v1933_v60, %v2019_v44  ;;  %v1057_v7 = vadd.f32 %v1049_v38, %v1021_v30 }
 0x169   : > { %v646_v59 = vpop.permute.xlu1 %645  ;;  %v770_v21 = vadd.f32 %v762_v54, %v734_v48  ;;  %v771_v37 = vadd.f32 %v763_v26, %v735_v55  ;;  %v987_v48 = vmul.f32 %v1935_v62, %v1990_v42  ;;  %v1050_v55 = vmul.f32 %v1951_v11, %v2004_v53 }
 0x16a   : > { %v654_v20 = vpop.permute.xlu0 %653  ;;  %820 = vrot.lane.b32.xlu0 %v805_v61, %s1586_s19  ;;  %v1022_v54 = vadd.f32 %v1014_v50, %v986_v1  ;;  %v1051_v1 = vmul.f32 %v1951_v11, %v2019_v44 }
 0x16b   : > { %v2023_v27 = vsel %vm659_vm2, %v654_v20, %v646_v59  ;;  %v806_v34 = vadd.f32 %v798_v63, %v770_v21  ;;  %v807_v51 = vadd.f32 %v799_v31, %v771_v37  ;;  %v2052_v21 = vsel %vm659_vm2, %v646_v59, %v654_v20 }
 0x16c   : > { %v736_v41 = vmul.f32 %v1928_v58, %v2023_v27  ;;  %v988_v62 = vmul.f32 %v1943_v5, %v2023_v27  ;;  %v1016_v63 = vmul.f32 %v1947_v8, %v1850_v16  ;;  %v1058_v20 = vadd.f32 %v1050_v55, %v1022_v54 }
 0x16d   : > { %v692_v32 = vpop.permute.xlu1 %691  ;;  %814 = vrot.lane.b32.xlu1 %v806_v34, %s1586_s19  ;;  %v1023_v30 = vadd.f32 %v1015_v17, %v987_v48  ;;  %v989_v48 = vmul.f32 %v1943_v5, %v2052_v21  ;;  %v1017_v54 = vmul.f32 %v1947_v8, %v1853_v19 }
 0x16e   : > { %v700_v40 = vpop.permute.xlu0 %699  ;;  %1064 = vrot.lane.b32.xlu0 %v1056_v33, %s1587_s30  ;;  %v772_v22 = vadd.f32 %v764_v47, %v736_v41  ;;  %v737_v33 = vmul.f32 %v1928_v58, %v2052_v21  ;;  %v1024_v11 = vadd.f32 %v1016_v63, %v988_v62 }
 0x16f   : > { %v2038_v46 = vsel %vm703_vm1, %v692_v32, %v700_v40  ;;  %v2072_v34 = vsel %vm703_vm1, %v700_v40, %v692_v32  ;;  %v765_v32 = vmul.f32 %v1926_v56, %v1853_v19  ;;  %v766_v40 = vmul.f32 %v1939_v3, %v1865_v28 }
 0x170   : > { %v800_v60 = vmul.f32 %v1945_v6, %v2038_v46  ;;  %v1052_v0 = vmul.f32 %v1959_v15, %v2038_v46  ;;  %v801_v31 = vmul.f32 %v1945_v6, %v2072_v34  ;;  %v1053_v5 = vmul.f32 %v1959_v15, %v2072_v34 }
 0x171   : > { %v648_v49 = vpop.permute.xlu1 %647  ;;  %822 = vrot.lane.b32.xlu1 %v807_v51, %s1586_s19  ;;  %v773_v6 = vadd.f32 %v765_v32, %v737_v33  ;;  %v1019_v51 = vmul.f32 %v1953_v12, %v1867_v29  ;;  %v767_v15 = vmul.f32 %v1939_v3, %v1867_v29 }
 0x172   : > { %v656_v61 = vpop.permute.xlu0 %655  ;;  %1072 = vrot.lane.b32.xlu0 %v1057_v7, %s1587_s30  ;;  %v808_v26 = vadd.f32 %v800_v60, %v772_v22  ;;  %v1059_v7 = vadd.f32 %v1051_v1, %v1023_v30  ;;  %v1060_v47 = vadd.f32 %v1052_v0, %v1024_v11  ;;  %v1025_v22 = vadd.f32 %v1017_v54, %v989_v48 }
 0x173   : > { %v2060_v36 = vsel %vm659_vm2, %v656_v61, %v648_v49  ;;  %v2084_v58 = vsel %vm659_vm2, %v648_v49, %v656_v61  ;;  %v809_v61 = vadd.f32 %v801_v31, %v773_v6  ;;  %v1018_v1 = vmul.f32 %v1953_v12, %v1865_v28 }
 0x174   : > { %v738_v38 = vmul.f32 %v1941_v4, %v2060_v36  ;;  %v991_v56 = vmul.f32 %v1955_v13, %v2084_v58  ;;  %v739_v62 = vmul.f32 %v1941_v4, %v2084_v58  ;;  %v1061_v0 = vadd.f32 %v1053_v5, %v1025_v22 }
 0x175   : > { %v702_v59 = vpop.permute.xlu1 %701  ;;  %1066 = vrot.lane.b32.xlu1 %v1058_v20, %s1587_s30 }
 0x176   : > { %v694_v37 = vpop.permute.xlu0 %693  ;;  %816 = vrot.lane.b32.xlu0 %v808_v26, %s1586_s19  ;;  %v774_v49 = vadd.f32 %v766_v40, %v738_v38  ;;  %v1027_v63 = vadd.f32 %v1019_v51, %v991_v56  ;;  %v990_v26 = vmul.f32 %v1955_v13, %v2060_v36  ;;  %v775_v30 = vadd.f32 %v767_v15, %v739_v62 }
 0x177   : > { %v2080_v50 = vsel %vm703_vm1, %v694_v37, %v702_v59  ;;  %v2098_v60 = vsel %vm703_vm1, %v702_v59, %v694_v37 }
 0x178   : > { %v802_v41 = vmul.f32 %v1949_v10, %v2080_v50  ;;  %v1055_v55 = vmul.f32 %v1957_v14, %v2098_v60  ;;  %v803_v8 = vmul.f32 %v1949_v10, %v2098_v60  ;;  %v1054_v10 = vmul.f32 %v1957_v14, %v2080_v50  ;;  %v459_v14 = vld [vmem:[%s2373_s4 + $0x18] sm:$0xff] }
 0x179   : > { %1074 = vrot.lane.b32.xlu1 %v1059_v7, %s1587_s30  ;;  %v1026_v38 = vadd.f32 %v1018_v1, %v990_v26 }
 0x17a   : > { %1068 = vrot.lane.b32.xlu0 %v1060_v47, %s1587_s30  ;;  %v810_v17 = vadd.f32 %v802_v41, %v774_v49  ;;  %v1063_v59 = vadd.f32 %v1055_v55, %v1027_v63  ;;  %v811_v33 = vadd.f32 %v803_v8, %v775_v30 }
 0x17b   : > { %v1062_v11 = vadd.f32 %v1054_v10, %v1026_v38  ;;  %v1438_v38 = vld [vmem:[%s2374_s5 + $0x6] sm:$0x3] }
 0x17d   : > { %824 = vrot.lane.b32.xlu1 %v809_v61, %s1586_s19 }
 0x17e   : > { %818 = vrot.lane.b32.xlu0 %v810_v17, %s1586_s19 }
 0x181   : > { %1076 = vrot.lane.b32.xlu1 %v1061_v0, %s1587_s30 }
 0x182   : > { %v864_v20 = vpop.permute.xlu1 %863  ;;  %1078 = vrot.lane.b32.xlu0 %v1063_v59, %s1587_s30 }
 0x183   : > { %v859_v4 = vpop.permute.xlu0 %858  ;;  %v878_v7 = vmul.f32 %v864_v20, %v1994_v43  ;;  %v879_v47 = vmul.f32 %v864_v20, %v1990_v42 }
 0x184   : > { %v876_v48 = vmul.f32 %v859_v4, %v1976_v25 }
 0x185   : > { %826 = vrot.lane.b32.xlu1 %v811_v33, %s1586_s19  ;;  %s1454_s19 = sshll.u32 %s1675_s25, 8  ;;  %s1588_s25 = smov [#allocation2]  }
 0x186   : > { %v892_v37 = vpop.permute.xlu1 %891  ;;  %s1368_s28 = scalar_lea.hbm %s2381_s12, %s1454_s19 }
 0x187   : > { %v887_v3 = vpop.permute.xlu0 %886  ;;  %v906_v32 = vmul.f32 %v892_v37, %v1837_v2  ;;  %v907_v40 = vmul.f32 %v892_v37, %v1843_v9  ;;  %v877_v2 = vmul.f32 %v859_v4, %v1972_v24 }
 0x188   : > { %v904_v12 = vmul.f32 %v887_v3, %v1826_v52  ;;  %v905_v41 = vmul.f32 %v887_v3, %v1829_v57 }
 0x189   : > { %1070 = vrot.lane.b32.xlu1 %v1062_v11, %s1587_s30  ;;  %v914_v56 = vadd.f32 %v906_v32, %v878_v7  ;;  %v915_v6 = vadd.f32 %v907_v40, %v879_v47  ;;  %s406_s30 = scalar_lea.vmem [#allocation2], %s1433_s17  ;;  %s1524_s17 = sshll.u32 %s1588_s25, 4  ;;  %s1525_s17 = int_to_ptr.vmem [resolvable:$false] %s1524_s17 }
 0x18a   : > { %v897_v13 = vpop.permute.xlu1 %896  ;;  %v912_v51 = vadd.f32 %v904_v12, %v876_v48  ;;  %v913_v54 = vadd.f32 %v905_v41, %v877_v2  ;;  %v2195_v12 = vrot.slane %v1438_v38, %v1820_v45  ;;  %s1370_s23 = sshll.u32 %s406_s30, 4  ;;  %s1526_s0 = scalar_lea.vmem %s1525_s17, 512  ;;  %s1371_s23 = int_to_ptr.vmem [resolvable:$true] %s1370_s23 }
 0x18b   : > { %v869_v31 = vpop.permute.xlu0 %868  ;;  %v908_v17 = vmul.f32 %v897_v13, %v1850_v16  ;;  %s1520_s16 = scalar_lea.vmem %s1371_s23, 256  ;;  %p1527_p0 = scmp.lt.s32.totalorder %s1371_s23, %s1525_s17 }
 0x18c   : > { %p1521_p11 = scmp.ne.s32.totalorder %s1371_s23, %s1520_s16  ;;  %p1528_p1 = scmp.lt.s32.totalorder %s1526_s0, %s1520_s16 }
 0x18d   : > { %1133 = vperm.xlu1 %1501, %v459_v14  }
 0x18e   : > { %v928_v9 = vpop.permute.xlu1 %927  ;;  %p1522_p12 = pnand %p1521_p11, %p1692_p5  ;;  %p1529_p2 = por %p1528_p1, %p1527_p0 }
 0x18f   : > { %v942_v52 = vmul.f32 %v928_v9, %v2004_v53  ;;  %v943_v57 = vmul.f32 %v928_v9, %v2019_v44  ;;  %v923_v49 = vpop.permute.xlu0 %922  ;;  %v909_v53 = vmul.f32 %v897_v13, %v1853_v19 }
 0x190   : > { %v940_v5 = vmul.f32 %v923_v49, %v1968_v23  ;;  %v941_v43 = vmul.f32 %v923_v49, %v1985_v35  ;;  %v880_v23 = vmul.f32 %v869_v31, %v2023_v27  ;;  %v881_v35 = vmul.f32 %v869_v31, %v2052_v21  ;;  %p1523_p13 = pneg %p1522_p12 }
 0x191   : > { %v2145_v42 = vadd.f32 %v942_v52, %v914_v56  ;;  %v2147_v25 = vadd.f32 %v943_v57, %v915_v6  ;;  %v2192_v31 = vrot.slane %v1438_v38, %v1812_v39 }
 0x192   : > { %v948_v24 = vadd.f32 %v940_v5, %v912_v51  ;;  %v949_v55 = vadd.f32 %v941_v43, %v913_v54  ;;  %v902_v61 = vpop.permute.xlu1 %901  ;;  %v917_v26 = vadd.f32 %v909_v53, %v881_v35  ;;  %p1530_p3 = pnand %p1529_p2, %p1523_p13 }
 0x193   : > { %v910_v44 = vmul.f32 %v902_v61, %v1865_v28  ;;  %v911_v62 = vmul.f32 %v902_v61, %v1867_v29  ;;  %v874_v22 = vpop.permute.xlu0 %873  ;;  %v916_v28 = vadd.f32 %v908_v17, %v880_v23 }
 0x194   : > { %v882_v63 = vmul.f32 %v874_v22, %v2060_v36  ;;  %v883_v8 = vmul.f32 %v874_v22, %v2084_v58 }
 0x196   : > { %v938_v0 = vpop.permute.xlu1 %937  ;;  %v918_v59 = vadd.f32 %v910_v44, %v882_v63  ;;  %v919_v15 = vadd.f32 %v911_v62, %v883_v8 }
 0x197   : > { %v946_v16 = vmul.f32 %v938_v0, %v2080_v50  ;;  %v947_v19 = vmul.f32 %v938_v0, %v2098_v60  ;;  %v933_v20 = vpop.permute.xlu0 %932  ;;  %v1437_v60 = vld [vmem:[%s2374_s5 + $0x4] sm:$0x3] }
 0x198   : > { %v944_v29 = vmul.f32 %v933_v20, %v2038_v46  ;;  %v945_v27 = vmul.f32 %v933_v20, %v2072_v34  ;;  %v2176_v10 = vrot.slane %v1437_v60, %v1812_v39  ;;  %v2179_v33 = vrot.slane %v1437_v60, %v1820_v45 }
 0x199   : > { %v2161_v4 = vadd.f32 %v946_v16, %v918_v59  ;;  %v2163_v21 = vadd.f32 %v947_v19, %v919_v15 }
 0x19a   : > { %v2165_v36 = vadd.f32 %v944_v29, %v916_v28  ;;  %v2167_v58 = vadd.f32 %v945_v27, %v917_v26  ;;  %v1124_v46 = vpop.permute.xlu1 %1123 }
 0x19b   : > { %v1119_v30 = vpop.permute.xlu0 %1118 }
 0x19f   : > { %v2169_v1 = vpop.permute.xlu0 %1128 }
 0x1d8   : > { %v813_v50 = vpop.permute.xlu0 %812 }
 0x1dc   : > { %v821_v34 = vpop.permute.xlu0 %820 }
 0x1dd   : > { %v829_v37 = vsel %vm828_vm3, %v813_v50, %v821_v34  ;;  %v833_v3 = vsel %vm828_vm3, %v821_v34, %v813_v50 }
 0x1de   : > { %v848_v32 = vmul.f32 %v2176_v10, %v833_v3  ;;  %v849_v40 = vmul.f32 %v2179_v33, %v829_v37 }
 0x1df   : > { %v815_v11 = vpop.permute.xlu1 %814 }
 0x1e0   : > { %v1065_v13 = vpop.permute.xlu0 %1064  ;;  %v956_v7 = vadd.f32 %v948_v24, %v848_v32  ;;  %v957_v47 = vadd.f32 %v949_v55, %v849_v40 }
 0x1e3   : > { %v823_v41 = vpop.permute.xlu1 %822 }
 0x1e4   : > { %v1073_v14 = vpop.permute.xlu0 %1072  ;;  %v830_v9 = vsel %vm828_vm3, %v815_v11, %v823_v41  ;;  %v834_v56 = vsel %vm828_vm3, %v823_v41, %v815_v11 }
 0x1e5   : > { %v1081_v48 = vsel %vm1080_vm4, %v1065_v13, %v1073_v14  ;;  %v1085_v2 = vsel %vm1080_vm4, %v1073_v14, %v1065_v13  ;;  %v850_v51 = vmul.f32 %v2176_v10, %v834_v56  ;;  %v851_v54 = vmul.f32 %v2179_v33, %v830_v9 }
 0x1e6   : > { %v1100_v6 = vmul.f32 %v2192_v31, %v1081_v48  ;;  %v1101_v45 = vmul.f32 %v2195_v12, %v1085_v2 }
 0x1e7   : > { %v1067_v49 = vpop.permute.xlu1 %1066  ;;  %v958_v17 = vadd.f32 %v2145_v42, %v850_v51  ;;  %v959_v53 = vadd.f32 %v2147_v25, %v851_v54 }
 0x1e8   : > { %v1108_v52 = vadd.f32 %v1100_v6, %v956_v7  ;;  %v1109_v57 = vadd.f32 %v1101_v45, %v957_v47  ;;  %v817_v22 = vpop.permute.xlu0 %816 }
 0x1ea   : > { %v1136_v5 = vadd.f32 %v1119_v30, %v1108_v52  ;;  %v1137_v43 = vadd.f32 %v1119_v30, %v1109_v57 }
 0x1eb   : > { %v1075_v24 = vpop.permute.xlu1 %1074 }
 0x1ec   : > { %v1144_v55 = vmax.f32 %v1136_v5, 0.0  ;;  %v1145_v61 = vmax.f32 %v1137_v43, 0.0  ;;  %v1082_v44 = vsel %vm1080_vm4, %v1067_v49, %v1075_v24  ;;  %v1086_v62 = vsel %vm1080_vm4, %v1075_v24, %v1067_v49  ;;  %v1069_v29 = vpop.permute.xlu0 %1068 }
 0x1ed   : > { %v1102_v23 = vmul.f32 %v2192_v31, %v1082_v44  ;;  %v1103_v35 = vmul.f32 %v2195_v12, %v1086_v62 }
 0x1ee   : > { %v2217_v63 = vmin.f32 %v1144_v55, 6.0  ;;  %v2219_v8 = vmin.f32 %v1145_v61, 6.0 }
 0x1ef   : > { %v1110_v0 = vadd.f32 %v1102_v23, %v958_v17  ;;  %v1111_v59 = vadd.f32 %v1103_v35, %v959_v53  ;;  %v825_v42 = vpop.permute.xlu1 %824 }
 0x1f0   : > { %v1160_v25 = vadd.f32 %v2219_v8, %v2217_v63  ;;  %v831_v15 = vsel %vm828_vm3, %v817_v22, %v825_v42  ;;  %v835_v16 = vsel %vm828_vm3, %v825_v42, %v817_v22  ;;  %v467_v42 = vld [vmem:[%s2375_s6] sm:$0xff] }
 0x1f1   : > { %v852_v19 = vmul.f32 %v2176_v10, %v835_v16  ;;  %v853_v20 = vmul.f32 %v2179_v33, %v831_v15  ;;  %v1138_v28 = vadd.f32 %v1124_v46, %v1110_v0  ;;  %v1139_v26 = vadd.f32 %v1124_v46, %v1111_v59 }
 0x1f2   : > { %1161 = vadd.xlane.f32.xlu0 %v1160_v25  ;;  %v469_v25 = vld [vmem:[%s2375_s6 + $0x10] sm:$0xff] }
 0x1f3   : > { %v1077_v27 = vpop.permute.xlu1 %1076  ;;  %v1146_v30 = vmax.f32 %v1138_v28, 0.0  ;;  %v1147_v50 = vmax.f32 %v1139_v26, 0.0  ;;  %v960_v60 = vadd.f32 %v2165_v36, %v852_v19  ;;  %v961_v34 = vadd.f32 %v2167_v58, %v853_v20  ;;  %v819_v58 = vpop.permute.xlu0 %818  ;;  %v470_v28 = vld [vmem:[%s2375_s6 + $0x18] sm:$0xff] }
 0x1f4   : > { %v1083_v37 = vsel %vm1080_vm4, %v1069_v29, %v1077_v27  ;;  %v1087_v3 = vsel %vm1080_vm4, %v1077_v27, %v1069_v29 }
 0x1f5   : > { %v1104_v38 = vmul.f32 %v2192_v31, %v1083_v37  ;;  %v1105_v11 = vmul.f32 %v2195_v12, %v1087_v3  ;;  %v2237_v13 = vmin.f32 %v1146_v30, 6.0  ;;  %v2239_v46 = vmin.f32 %v1147_v50, 6.0 }
 0x1f7   : > { %v1112_v32 = vadd.f32 %v1104_v38, %v960_v60  ;;  %v1113_v40 = vadd.f32 %v1105_v11, %v961_v34  ;;  %v827_v41 = vpop.permute.xlu1 %826  ;;  %v1163_v36 = vadd.f32 %v2239_v46, %v2237_v13  ;;  %v1079_v52 = vpop.permute.xlu0 %1078 }
 0x1f8   : > { %v832_v6 = vsel %vm828_vm3, %v819_v58, %v827_v41  ;;  %v836_v45 = vsel %vm828_vm3, %v827_v41, %v819_v58 }
 0x1f9   : > { %1164 = vadd.xlane.f32.xlu1 %v1163_v36  ;;  %v1140_v14 = vadd.f32 %v2169_v1, %v1112_v32  ;;  %v1141_v7 = vadd.f32 %v2169_v1, %v1113_v40  ;;  %v854_v51 = vmul.f32 %v2176_v10, %v836_v45  ;;  %v855_v54 = vmul.f32 %v2179_v33, %v832_v6  ;;  %v471_v36 = vld [vmem:[%s2376_s7] sm:$0x1]  ;;  %v473_v6 = vld [vmem:[%s2377_s8 + $0x8] sm:$0xff] }
 0x1fa   : > { %v472_v45 = vld [vmem:[%s2377_s8] sm:$0xff] }
 0x1fb   : > { %v1148_v47 = vmax.f32 %v1140_v14, 0.0  ;;  %v1149_v48 = vmax.f32 %v1141_v7, 0.0  ;;  %v1071_v2 = vpop.permute.xlu1 %1070  ;;  %v962_v24 = vadd.f32 %v2161_v4, %v854_v51  ;;  %v963_v55 = vadd.f32 %v2163_v21, %v855_v54  ;;  %v468_v21 = vld [vmem:[%s2375_s6 + $0x8] sm:$0xff] }
 0x1fc   : > { %v1084_v1 = vsel %vm1080_vm4, %v1071_v2, %v1079_v52  ;;  %v1088_v49 = vsel %vm1080_vm4, %v1079_v52, %v1071_v2 }
 0x1fd   : > { %v2245_v9 = vmin.f32 %v1148_v47, 6.0  ;;  %v2247_v56 = vmin.f32 %v1149_v48, 6.0  ;;  %v1106_v5 = vmul.f32 %v2192_v31, %v1084_v1  ;;  %v1107_v43 = vmul.f32 %v2195_v12, %v1088_v49  ;;  %v475_v47 = vld [vmem:[%s2377_s8 + $0x18] sm:$0xff]  ;;  %v474_v48 = vld [vmem:[%s2377_s8 + $0x10] sm:$0xff] }
 0x1ff   : > { %v1166_v57 = vadd.f32 %v2247_v56, %v2245_v9  ;;  %v1114_v61 = vadd.f32 %v1106_v5, %v962_v24  ;;  %v1115_v17 = vadd.f32 %v1107_v43, %v963_v55  ;;  %v479_v43 = vld [vmem:[%s2378_s9 + $0x18] sm:$0xff]  ;;  %v478_v24 = vld [vmem:[%s2378_s9 + $0x10] sm:$0xff] }
 0x201   : > { %1167 = vadd.xlane.f32.xlu0 %v1166_v57 }
 0x208   : > { %v1134_v53 = vpop.permute.xlu1 %1133 }
 0x209   : > { %v1142_v44 = vadd.f32 %v1134_v53, %v1114_v61  ;;  %v1143_v62 = vadd.f32 %v1134_v53, %v1115_v17 }
 0x20b   : > { %v1150_v18 = vmax.f32 %v1142_v44, 0.0  ;;  %v1151_v22 = vmax.f32 %v1143_v62, 0.0  ;;  %v477_v44 = vld [vmem:[%s2378_s9 + $0x8] sm:$0xff]  ;;  %v476_v62 = vld [vmem:[%s2378_s9] sm:$0xff] }
 0x20d   : > { %v2265_v23 = vmin.f32 %v1150_v18, 6.0  ;;  %v2267_v10 = vmin.f32 %v1151_v22, 6.0 }
 0x20f   : > { %v1169_v33 = vadd.f32 %v2267_v10, %v2265_v23 }
 0x211   : > { %1170 = vadd.xlane.f32.xlu0 %v1169_v33 }
 0x27b   : > { %v1162_v31 = vpop.xlane.xlu0 %1161 }
 0x27c   : > { %v1172_v0 = vmul.f32 0.00390625, %v1162_v31 }
 0x27e   : > { %v1176_v16 = vmul.f32 %v1172_v0, %v467_v42 }
 0x280   : > { %v1180_v29 = vsel %vm504_vm0, %v1176_v16, 0.0 }
 0x282   : > { %v1165_v12 = vpop.xlane.xlu1 %1164 }
 0x283   : > { %v1173_v35 = vmul.f32 0.00390625, %v1165_v12 }
 0x285   : > { %v1177_v15 = vmul.f32 %v1173_v35, %v468_v21 }
 0x287   : > { %v1181_v20 = vsel %vm504_vm0, %v1177_v15, 0.0 }
 0x288   : > { %v1182_v50 = vadd.f32 %v1181_v20, %v1180_v29  ;;  %v481_v29 = vld [vmem:[%s2380_s11] sm:$0xff] }
 0x28a   : > { %v1168_v4 = vpop.xlane.xlu0 %1167 }
 0x28b   : > { %v1174_v59 = vmul.f32 0.00390625, %v1168_v4 }
 0x28d   : > { %v1178_v19 = vmul.f32 %v1174_v59, %v469_v25 }
 0x28f   : > { %v1183_v27 = vsel %vm504_vm0, %v1178_v19, 0.0 }
 0x290   : > { %v1184_v34 = vadd.f32 %v1183_v27, %v1182_v50 }
 0x29a   : > { %v1171_v26 = vpop.xlane.xlu0 %1170 }
 0x29b   : > { %v1175_v30 = vmul.f32 0.00390625, %v1171_v26 }
 0x29d   : > { %v1179_v60 = vmul.f32 %v1175_v30, %v470_v28 }
 0x29f   : > { %v1185_v37 = vsel %vm504_vm0, %v1179_v60, 0.0 }
 0x2a0   : > { %v1186_v3 = vadd.f32 %v1185_v37, %v1184_v34 }
 0x2a2   : > { %v1187_v38 = vrot.slane %v1186_v3, 4 }
 0x2a4   : > { %v1188_v11 = vadd.f32 %v1187_v38, %v1186_v3 }
 0x2a6   : > { %v1189_v32 = vrot.slane %v1188_v11, 2 }
 0x2a8   : > { %v1190_v40 = vadd.f32 %v1189_v32, %v1188_v11 }
 0x2aa   : > { %v1191_v41 = vrot.slane %v1190_v40, 1 }
 0x2ac   : > { %v1192_v58 = vadd.f32 %v1191_v41, %v1190_v40 }
 0x2ae   : > { %v1193_v14 = vadd.f32 %v1192_v58, %v471_v36 }
 0x2b0   : > { %v1194_v7 = vmax.f32 %v1193_v14, 0.0  ;;  %v1519_v14 = vld [vmem:[%s1716_s15 + $0x8] sm:$0xff] }
 0x2b2   : > { %v1198_v2 = vrot.slane %v1194_v7, %v1812_v39 }
 0x2b4   : > { %v1202_v52 = vmul.f32 %v1198_v2, %v475_v47  ;;  %v1201_v57 = vmul.f32 %v1198_v2, %v474_v48  ;;  %v1200_v51 = vmul.f32 %v1198_v2, %v473_v6  ;;  %v1199_v54 = vmul.f32 %v1198_v2, %v472_v45 }
 0x2b6   : > { %v1212_v1 = vsel %vm504_vm0, %v1202_v52, 0.0  ;;  %v1209_v49 = vsel %vm504_vm0, %v1201_v57, 0.0  ;;  %v1206_v39 = vsel %vm504_vm0, %v1200_v51, 0.0  ;;  %v1203_v5 = vsel %vm504_vm0, %v1199_v54, 0.0 }
 0x2b7   : > { %1213 = vadd.xlane.f32.xlu1 %v1212_v1  ;;  %1210 = vadd.xlane.f32.xlu0 %v1209_v49 }
 0x2bb   : > { %1207 = vadd.xlane.f32.xlu1 %v1206_v39  ;;  %1204 = vadd.xlane.f32.xlu0 %v1203_v5 }
 0x340   : > { %v1214_v55 = vpop.xlane.xlu1 %1213  ;;  %v1211_v61 = vpop.xlane.xlu0 %1210 }
 0x341   : > { %v1218_v17 = vadd.f32 %v1214_v55, %v479_v43  ;;  %v1217_v53 = vadd.f32 %v1211_v61, %v478_v24 }
 0x343   : > { %v1446_v18 = vmul.f32 -1.442695, %v1218_v17  ;;  %v1445_v22 = vmul.f32 -1.442695, %v1217_v53 }
 0x344   : > { %v1208_v33 = vpop.xlane.xlu1 %1207  ;;  %v1205_v31 = vpop.xlane.xlu0 %1204 }
 0x345   : > { %1502 = vpow2.f32 %v1446_v18  ;;  %v1216_v12 = vadd.f32 %v1208_v33, %v477_v44  ;;  %v1215_v4 = vadd.f32 %v1205_v31, %v476_v62 }
 0x346   : > { %1504 = vpow2.f32 %v1445_v22 }
 0x347   : > { %v1444_v35 = vmul.f32 -1.442695, %v1216_v12  ;;  %v1443_v21 = vmul.f32 -1.442695, %v1215_v4 }
 0x349   : > { %1506 = vpow2.f32 %v1444_v35 }
 0x34a   : > { %1508 = vpow2.f32 %v1443_v21 }
 0x352   : > { %v1503_v0 = vpop.eup %1502 }
 0x353   : > { %v1505_v59 = vpop.eup %1504  ;;  %v1234_v42 = vadd.f32 1.0, %v1503_v0 }
 0x354   : > { %v1233_v25 = vadd.f32 1.0, %v1505_v59 }
 0x355   : > { %1510 = vrcp.f32 %v1234_v42 }
 0x356   : > { %v1507_v15 = vpop.eup %1506  ;;  %1512 = vrcp.f32 %v1233_v25 }
 0x357   : > { %v1509_v16 = vpop.eup %1508  ;;  %v1232_v19 = vadd.f32 1.0, %v1507_v15 }
 0x358   : > { %v1231_v20 = vadd.f32 1.0, %v1509_v16 }
 0x359   : > { %1514 = vrcp.f32 %v1232_v19 }
 0x35a   : > { %1516 = vrcp.f32 %v1231_v20 }
 0x362   : > { %v1511_v28 = vpop.eup %1510 }
 0x363   : > { %v1513_v26 = vpop.eup %1512  ;;  %1260 = vperm.xlu1 %1501, %v1511_v28  }
 0x364   : > { %1255 = vperm.xlu0 %1500, %v1513_v26  }
 0x366   : > { %v1515_v27 = vpop.eup %1514 }
 0x367   : > { %1250 = vperm.xlu1 %1501, %v1515_v27   ;;  %v1517_v30 = vpop.eup %1516 }
 0x368   : > { %1273 = vperm.xlu0 %1500, %v481_v29  }
 0x36b   : > { %1245 = vperm.xlu1 %1501, %v1517_v30  }
 0x3de   : > { %v1261_v50 = vpop.permute.xlu1 %1260 }
 0x3df   : > { %v1256_v60 = vpop.permute.xlu0 %1255  ;;  %v1270_v34 = vmul.f32 %v1261_v50, %v2267_v10  ;;  %v1269_v37 = vmul.f32 %v1261_v50, %v2265_v23 }
 0x3e0   : > { %v1268_v3 = vmul.f32 %v1256_v60, %v2247_v56  ;;  %v1267_v38 = vmul.f32 %v1256_v60, %v2245_v9  ;;  %v480_v9 = vld [vmem:[%s2379_s10] sm:$0xff] }
 0x3e1   : > { %1304 = vmatprep.subr.mxu1 %v1270_v34 }
 0x3e2   : > { %1305 = vmatpush1.msra.mxu1 %v1269_v37  ;;  %v1251_v11 = vpop.permute.xlu1 %1250 }
 0x3e3   : > { %v1265_v32 = vmul.f32 %v1251_v11, %v2237_v13  ;;  %v1266_v40 = vmul.f32 %v1251_v11, %v2239_v46  ;;  %1306 = vmatprep.subr.mxu1 %v1268_v3  ;;  %v1274_v13 = vpop.permute.xlu0 %1273 }
 0x3e4   : > { %1307 = vmatpush1.msra.mxu1 %v1267_v38 }
 0x3e5   : > { %1308 = vmatprep.subr.mxu1 %v1266_v40 }
 0x3e6   : > { %v1246_v41 = vpop.permute.xlu1 %1245  ;;  %1309 = vmatpush1.msra.mxu1 %v1265_v32 }
 0x3e7   : > { %v1263_v23 = vmul.f32 %v1246_v41, %v2217_v63  ;;  %v1264_v56 = vmul.f32 %v1246_v41, %v2219_v8  ;;  %v1518_v63 = vld [vmem:[%s1716_s15] sm:$0xff] }
 0x3e9   : > { %1310 = vmatprep.subr.mxu1 %v1264_v56 }
 0x3ea   : > { %1311 = vmatpush1.msra.mxu1 %v1263_v23 }
 0x3eb   : > { %1447 = vmatmul.mubr.msk.f32.vlgmr.msra.gmra.mxu1 %vm1276_vm5, %v480_v9 }
 0x4ab   : > { %v1346_v46 = vpop.f32.mrf.mxu1 }
 0x4ac   : > { %v1347_v10 = vadd.f32 %v1346_v46, %v1274_v13 }
 0x4ad   : > { %v1348_v36 = vpop.f32.mrf.mxu1 }
 0x4ae   : > { %v1351_v8 = vadd.f32 %v1518_v63, %v1347_v10  ;;  %v1349_v58 = vadd.f32 %v1348_v36, %v1274_v13 }
 0x4b0   : > { %1353 = vst [vmem:[%s406_s30] sm:$0xff] %v1351_v8  ;;  %v1352_v7 = vadd.f32 %v1519_v14, %v1349_v58 }
 0x4b2   : > { %1354 = vst [vmem:[%s406_s30 + $0x8] sm:$0xff] %v1352_v7 }
 0x4b3   : > { %1533 = shalt.err (!%p1530_p3)
}
 0x4b4   : > { %s1534_s15 = scalar_lea.hbm %s1368_s28, 256  ;;  %s1538_s30 = scalar_lea.hbm %s2381_s12, 512 }
 0x4b5   : > { %p1535_p4 = scmp.ne.s32.totalorder %s1368_s28, %s1534_s15  ;;  %p1539_p9 = scmp.lt.s32.totalorder %s1368_s28, %s2381_s12 }
 0x4b6   : > { %p1540_p10 = scmp.lt.s32.totalorder %s1538_s30, %s1534_s15 }
 0x4b7   : > { %p1536_p7 = pnand %p1535_p4, %p1692_p5 }
 0x4b8   : > { %p1541_p11 = por %p1540_p10, %p1539_p9 }
 0x4b9   : > { %p1537_p8 = pneg %p1536_p7 }
 0x4bb   : > { %p1542_p12 = pnand %p1541_p11, %p1537_p8 }
 0x4bd   : > { %1545 = shalt.err (!%p1542_p12)
}
 0x4be   : > { %1455 = dma.vmem_to_hbm [thread:$0]  (%p1692_p5), %s1371_s23, 256, %s1368_s28, %s1356_s29  }
 0x4bf PF: > { %p1461_p13 = scmp.ge.s32.totalorder %s1580_s24, 2  ;;  %s1382_s0 = sand.u32 1, %s1568_s21  }
 0x4c0   : > { %s1383_s16 = scalar_lea.sflag [#allocation3], %s1382_s0 }
 0x4c1   : > { %p1458_p0 = pnand %p1461_p13, %p1696_p6 }
 0x4c3   : > { %p1459_p1 = pneg %p1458_p0 }
 0x4c5   : > { %1563 = dma.done.wait (%p1459_p1), %s1383_s16, 256  }
 0x4c6   : > { %1565 = vsyncadd (%p1459_p1), %s1383_s16, 4294967040  ;;  %s2389_s25 = sld [smem:[#allocation5_spill]]  ;;  %p22_p2 = scmp.ge.s32.totalorder %s1679_s27, 4  }
 0x4c7   : > { %s2390_s23 = sld [smem:[#allocation6_spill]]  ;;  %s2391_s21 = smov %s1572_s22 }
 0x4c8   : > { %s2393_s24 = smov %s1679_s27  ;;  %24 = sbr.rel (!%p22_p2) target bundleno = 5 (0x5), region = 106 }
 0x4cc   : > { %s2392_s22 = smov %s2389_s25 }
 0x4cd   :  { %1388 = vsyncpa [#allocation3], 1 }
 0x4ce   :  { %1390 = vsyncpa [#allocation3 + $0x1], 1 }

</bundles_post_ra>
